<compile_context>
chip_gen: v5e
topology: v5e:2x2
jax: 0.10.0
libtpu: 0.0.40
codegen_flags: <defaults>
</compile_context>

<pallas_src>
import functools
import math

import jax
import jax.numpy as jnp
from jax.experimental import pallas as pl
from jax.experimental.pallas import tpu as pltpu


def _round_up(x, m):
    return (x + m - 1) // m * m


def conv_stats_kernel(xf_ref, w_ref, mask_ref, out_ref, sum_ref, ssq_ref, *, KH, KW, Wp):
    """Per-image conv (as lane-shifted VPU FMAs) + masked per-channel partial stats.

    xf_ref:   (1, Cin, Lin)   flattened zero-padded image, lane axis padded
    w_ref:    (Cout, KH*KW*Cin) binarized*coef weights, tap-major (kh, kw, ci)
    mask_ref: (1, Lout)        1.0 at valid output anchors, 0.0 elsewhere
    out_ref:  (1, Cout, Lout)  conv output in the padded-frame layout
    sum_ref:  (1, Cout, 1)     per-channel sum over valid anchors
    ssq_ref:  (1, Cout, 1)     per-channel sum of squares over valid anchors
    """
    _, Cin, _ = xf_ref.shape
    _, Cout, Lout = out_ref.shape

    x = xf_ref[0]          # (Cin, Lin)  loaded once; taps below are value lane-slices
    w = w_ref[...]         # (Cout, KH*KW*Cin)  one vreg

    acc = jnp.zeros((Cout, Lout), jnp.float32)
    j = 0
    for kh in range(KH):
        for kw in range(KW):
            delta = kh * Wp + kw
            shifted = x[:, delta:delta + Lout]          # (Cin, Lout): pure lane shift
            for ci in range(Cin):
                # broadcast FMA on the VPU: (Cout,1) * (1,Lout) -> (Cout,Lout)
                acc = acc + w[:, j:j + 1] * shifted[ci:ci + 1, :]
                j += 1

    out_ref[0] = acc

    # partial BN statistics over valid output anchors only
    accm = acc * mask_ref[...]
    sum_ref[0] = jnp.sum(accm, axis=1, keepdims=True)          # lane-axis XLU reduce
    ssq_ref[0] = jnp.sum(accm * accm, axis=1, keepdims=True)


def bn_apply_kernel(y_ref, scale_ref, shift_ref, out_ref):
    """Pass 2: per-channel affine (BN folded to scale/shift). Lane-dense in/out."""
    out_ref[0] = y_ref[0] * scale_ref[...] + shift_ref[...]


def conv_bn_bias2(x_nchw, mask_val, coef, bias, gamma, beta, *, padding=1, stride=1):
    """ConvBnBias2(merge=False) forward. x_nchw: (N, Cin, H, W) float32 -> (N, Cout, Ho, Wo)."""
    del bias  # exactly cancelled by train-mode BatchNorm (per-channel constant)
    assert stride == 1, "only stride=1 (module default) is implemented"

    N, Cin, H, W = x_nchw.shape
    Cout, Cin2, KH, KW = mask_val.shape
    assert Cin2 == Cin

    Hp, Wp = H + 2 * padding, W + 2 * padding
    Ho, Wo = Hp - KH + 1, Wp - KW + 1          # output spatial size
    P = Hp * Wp                                 # padded frame, flattened
    Lout = _round_up(P, 128)                    # lane-dense output length
    halo = (KH - 1) * Wp + (KW - 1)             # max lane shift of any tap
    Lin = Lout + _round_up(halo, 128)           # input length (shift headroom)

    # --- hoisted weight prep (one-time, tiny): BinarizeFn(mask)*coef ---
    wq = jnp.where(mask_val > 0, 1.0, -1.0).astype(jnp.float32) * coef.astype(jnp.float32)
    # tap-major (kh, kw, ci) column order to match the kernel loop
    w2d = jnp.transpose(wq, (0, 2, 3, 1)).reshape(Cout, KH * KW * Cin)

    # --- input: NCHW -> zero-pad spatial -> flatten padded frame onto lanes ---
    # (layout plumbing stays in the wrapper; inside the kernel there are no relayouts)
    xpad = jnp.pad(x_nchw.astype(jnp.float32),
                   ((0, 0), (0, 0), (padding, padding), (padding, padding)))
    xf = xpad.reshape(N, Cin, P)
    xf = jnp.pad(xf, ((0, 0), (0, 0), (0, Lin - P)))        # (N, Cin, Lin)

    # valid output anchors inside the padded frame (rest is sliced away at the end)
    lane = jnp.arange(Lout)
    valid = ((lane // Wp) < Ho) & ((lane % Wp) < Wo)
    maskv = valid.astype(jnp.float32)[None, :]              # (1, Lout)

    # --- pass 1: conv + per-image partial stats, grid over batch ("parallel") ---
    conv_out, psum, pssq = pl.pallas_call(
        functools.partial(conv_stats_kernel, KH=KH, KW=KW, Wp=Wp),
        out_shape=(jax.ShapeDtypeStruct((N, Cout, Lout), jnp.float32),
                   jax.ShapeDtypeStruct((N, Cout, 1), jnp.float32),
                   jax.ShapeDtypeStruct((N, Cout, 1), jnp.float32)),
        grid=(N,),
        in_specs=[pl.BlockSpec((1, Cin, Lin), lambda n: (n, 0, 0)),
                  pl.BlockSpec((Cout, KH * KW * Cin), lambda n: (0, 0)),
                  pl.BlockSpec((1, Lout), lambda n: (0, 0))],
        out_specs=(pl.BlockSpec((1, Cout, Lout), lambda n: (n, 0, 0)),
                   pl.BlockSpec((1, Cout, 1), lambda n: (n, 0, 0)),
                   pl.BlockSpec((1, Cout, 1), lambda n: (n, 0, 0))),
        compiler_params=pltpu.CompilerParams(dimension_semantics=("parallel",)),
    )(xf, w2d, maskv)

    # --- reduce the tiny partials; fold train-mode BN into per-channel scale/shift ---
    cnt = jnp.float32(N * Ho * Wo)
    mean = jnp.sum(psum[:, :, 0], axis=0) / cnt
    var = jnp.sum(pssq[:, :, 0], axis=0) / cnt - mean * mean   # biased variance
    scale = gamma.astype(jnp.float32) * jax.lax.rsqrt(var + 1e-5)
    shift = beta.astype(jnp.float32) - mean * scale

    # --- pass 2: apply BN affine, grid over batch ("parallel"), lane-dense output ---
    out = pl.pallas_call(
        bn_apply_kernel,
        out_shape=jax.ShapeDtypeStruct((N, Cout, Lout), jnp.float32),
        grid=(N,),
        in_specs=[pl.BlockSpec((1, Cout, Lout), lambda n: (n, 0, 0)),
                  pl.BlockSpec((Cout, 1), lambda n: (0, 0)),
                  pl.BlockSpec((Cout, 1), lambda n: (0, 0))],
        out_specs=pl.BlockSpec((1, Cout, Lout), lambda n: (n, 0, 0)),
        compiler_params=pltpu.CompilerParams(dimension_semantics=("parallel",)),
    )(conv_out, scale[:, None], shift[:, None])

    # drop lane padding & invalid frame columns -> NCHW directly (no transpose needed)
    return out[:, :, :P].reshape(N, Cout, Hp, Wp)[:, :, :Ho, :Wo]


def reference(x, mask_val, coef, bias, gamma, beta):
    """Pure-JAX reference mirroring the PyTorch forward (incl. the redundant conv bias)."""
    w = jnp.where(mask_val > 0, 1.0, -1.0) * coef
    y = jax.lax.conv_general_dilated(
        x, w, window_strides=(1, 1), padding=((1, 1), (1, 1)),
        dimension_numbers=("NCHW", "OIHW", "NCHW"))
    y = y + bias[None, :, None, None]
    mean = jnp.mean(y, axis=(0, 2, 3), keepdims=True)
    var = jnp.mean((y - mean) ** 2, axis=(0, 2, 3), keepdims=True)
    return ((y - mean) * jax.lax.rsqrt(var + 1e-5)
            * gamma[None, :, None, None] + beta[None, :, None, None])


if __name__ == "__main__":
    N, Cin, Cout, H, W, K = 2, 4, 8, 16, 16, 3

    key = jax.random.PRNGKey(0)
    k_x, k_mask, k_coef, k_bias = jax.random.split(key, 4)

    x = jax.random.normal(k_x, (N, Cin, H, W), dtype=jnp.float32)

    # MaskConv2d.__init__: mask_val ~ N(0,1); coef, bias ~ U(-stdv, stdv)
    # with stdv = 1/sqrt(Cin*K*K). BatchNorm2d affine init: gamma=1, beta=0.
    stdv = 1.0 / math.sqrt(Cin * K * K)
    mask_val = jax.random.normal(k_mask, (Cout, Cin, K, K), dtype=jnp.float32)
    coef = jax.random.uniform(k_coef, (Cout, Cin, 1, 1), dtype=jnp.float32,
                              minval=-stdv, maxval=stdv)
    bias = jax.random.uniform(k_bias, (Cout,), dtype=jnp.float32,
                              minval=-stdv, maxval=stdv)
    gamma = jnp.ones((Cout,), jnp.float32)
    beta = jnp.zeros((Cout,), jnp.float32)

    fwd = jax.jit(conv_bn_bias2)
    out = fwd(x, mask_val, coef, bias, gamma, beta)
    out = jax.block_until_ready(out)

    ref = reference(x, mask_val, coef, bias, gamma, beta)
    assert out.shape == (N, Cout, H, W)
    assert jnp.allclose(out, ref, rtol=1e-4, atol=1e-4), (
        float(jnp.max(jnp.abs(out - ref))))

    print("KERNEL_OK")
</pallas_src>

<mosaic_0001>
module attributes {stable_mosaic.version = 11 : i64} {
  func.func @bn_apply_kernel(%arg0: i32, %arg1: memref<1x8x384xf32, #tpu.memory_space<vmem>>, %arg2: memref<8x1xf32, #tpu.memory_space<vmem>>, %arg3: memref<8x1xf32, #tpu.memory_space<vmem>>, %arg4: memref<1x8x384xf32, #tpu.memory_space<vmem>>) attributes {dimension_semantics = [#tpu.dimension_semantics<parallel>], iteration_bounds = array<i64: 2>, scalar_prefetch = 0 : i64, scratch_operands = 0 : i64, tpu.core_type = #tpu.core_type<tc>, window_params = [{transform_indices = @transform_0, window_bounds = array<i64: 1, 8, 384>}, {pipeline_mode = #tpu.pipeline_mode<synchronous>, transform_indices = @transform_1, window_bounds = array<i64: 8, 1>}, {pipeline_mode = #tpu.pipeline_mode<synchronous>, transform_indices = @transform_2, window_bounds = array<i64: 8, 1>}, {transform_indices = @transform_3, window_bounds = array<i64: 1, 8, 384>}]} {
    %c0 = arith.constant 0 : index
    %c0_0 = arith.constant 0 : index
    %c0_1 = arith.constant 0 : index
    %0 = vector.load %arg1[%c0, %c0_0, %c0_1] : memref<1x8x384xf32, #tpu.memory_space<vmem>>, vector<1x8x384xf32>
    %1 = vector.shape_cast %0 : vector<1x8x384xf32> to vector<8x384xf32>
    %c0_2 = arith.constant 0 : index
    %c0_3 = arith.constant 0 : index
    %2 = vector.load %arg2[%c0_2, %c0_3] : memref<8x1xf32, #tpu.memory_space<vmem>>, vector<8x1xf32>
    %3 = vector.broadcast %2 : vector<8x1xf32> to vector<8x384xf32>
    %4 = arith.mulf %1, %3 : vector<8x384xf32>
    %c0_4 = arith.constant 0 : index
    %c0_5 = arith.constant 0 : index
    %5 = vector.load %arg3[%c0_4, %c0_5] : memref<8x1xf32, #tpu.memory_space<vmem>>, vector<8x1xf32>
    %6 = vector.broadcast %5 : vector<8x1xf32> to vector<8x384xf32>
    %7 = arith.addf %4, %6 : vector<8x384xf32>
    %c0_6 = arith.constant 0 : index
    %c0_7 = arith.constant 0 : index
    %c0_8 = arith.constant 0 : index
    %8 = vector.load %arg4[%c0_6, %c0_7, %c0_8] : memref<1x8x384xf32, #tpu.memory_space<vmem>>, vector<1x8x384xf32>
    %9 = vector.shape_cast %8 : vector<1x8x384xf32> to vector<8x384xf32>
    %10 = vector.shape_cast %7 : vector<8x384xf32> to vector<1x8x384xf32>
    tpu.vector_store %arg4[%c0_6, %c0_7, %c0_8], %10 {strides = array<i32>} : memref<1x8x384xf32, #tpu.memory_space<vmem>>, vector<1x8x384xf32>,
    return
  }
  func.func @transform_0(%arg0: i32) -> (i32, i32, i32) {
    %c0_i32 = arith.constant 0 : i32
    %c0_i32_0 = arith.constant 0 : i32
    %c0_i32_1 = arith.constant 0 : i32
    return %arg0, %c0_i32, %c0_i32_0 : i32, i32, i32
  }
  func.func @transform_1(%arg0: i32) -> (i32, i32) {
    %c0_i32 = arith.constant 0 : i32
    %c0_i32_0 = arith.constant 0 : i32
    %c0_i32_1 = arith.constant 0 : i32
    return %c0_i32, %c0_i32_0 : i32, i32
  }
  func.func @transform_2(%arg0: i32) -> (i32, i32) {
    %c0_i32 = arith.constant 0 : i32
    %c0_i32_0 = arith.constant 0 : i32
    %c0_i32_1 = arith.constant 0 : i32
    return %c0_i32, %c0_i32_0 : i32, i32
  }
  func.func @transform_3(%arg0: i32) -> (i32, i32, i32) {
    %c0_i32 = arith.constant 0 : i32
    %c0_i32_0 = arith.constant 0 : i32
    %c0_i32_1 = arith.constant 0 : i32
    return %arg0, %c0_i32, %c0_i32_0 : i32, i32, i32
  }
}

module attributes {stable_mosaic.version = 11 : i64} {
  func.func @conv_stats_kernel(%arg0: i32, %arg1: memref<1x4x512xf32, #tpu.memory_space<vmem>>, %arg2: memref<8x36xf32, #tpu.memory_space<vmem>>, %arg3: memref<1x384xf32, #tpu.memory_space<vmem>>, %arg4: memref<1x8x384xf32, #tpu.memory_space<vmem>>, %arg5: memref<1x8x1xf32, #tpu.memory_space<vmem>>, %arg6: memref<1x8x1xf32, #tpu.memory_space<vmem>>) attributes {dimension_semantics = [#tpu.dimension_semantics<parallel>], iteration_bounds = array<i64: 2>, scalar_prefetch = 0 : i64, scratch_operands = 0 : i64, tpu.core_type = #tpu.core_type<tc>, window_params = [{transform_indices = @transform_0, window_bounds = array<i64: 1, 4, 512>}, {pipeline_mode = #tpu.pipeline_mode<synchronous>, transform_indices = @transform_1, window_bounds = array<i64: 8, 36>}, {pipeline_mode = #tpu.pipeline_mode<synchronous>, transform_indices = @transform_2, window_bounds = array<i64: 1, 384>}, {transform_indices = @transform_3, window_bounds = array<i64: 1, 8, 384>}, {transform_indices = @transform_4, window_bounds = array<i64: 1, 8, 1>}, {transform_indices = @transform_5, window_bounds = array<i64: 1, 8, 1>}]} {
    %c0 = arith.constant 0 : index
    %c0_0 = arith.constant 0 : index
    %c0_1 = arith.constant 0 : index
    %0 = vector.load %arg1[%c0, %c0_0, %c0_1] : memref<1x4x512xf32, #tpu.memory_space<vmem>>, vector<1x4x512xf32>
    %1 = vector.shape_cast %0 : vector<1x4x512xf32> to vector<4x512xf32>
    %c0_2 = arith.constant 0 : index
    %c0_3 = arith.constant 0 : index
    %2 = vector.load %arg2[%c0_2, %c0_3] : memref<8x36xf32, #tpu.memory_space<vmem>>, vector<8x36xf32>
    %cst = arith.constant 0.000000e+00 : f32
    %3 = vector.broadcast %cst : f32 to vector<8x384xf32>
    %4 = vector.extract_strided_slice %1 {offsets = [0, 0], sizes = [4, 384], strides = [1, 1]} : vector<4x512xf32> to vector<4x384xf32>
    %5 = vector.extract_strided_slice %2 {offsets = [0, 0], sizes = [8, 1], strides = [1, 1]} : vector<8x36xf32> to vector<8x1xf32>
    %6 = vector.extract_strided_slice %4 {offsets = [0, 0], sizes = [1, 384], strides = [1, 1]} : vector<4x384xf32> to vector<1x384xf32>
    %7 = vector.broadcast %5 : vector<8x1xf32> to vector<8x384xf32>
    %8 = vector.broadcast %6 : vector<1x384xf32> to vector<8x384xf32>
    %9 = arith.mulf %7, %8 : vector<8x384xf32>
    %10 = arith.addf %3, %9 : vector<8x384xf32>
    %11 = vector.extract_strided_slice %2 {offsets = [0, 1], sizes = [8, 1], strides = [1, 1]} : vector<8x36xf32> to vector<8x1xf32>
    %12 = vector.extract_strided_slice %4 {offsets = [1, 0], sizes = [1, 384], strides = [1, 1]} : vector<4x384xf32> to vector<1x384xf32>
    %13 = vector.broadcast %11 : vector<8x1xf32> to vector<8x384xf32>
    %14 = vector.broadcast %12 : vector<1x384xf32> to vector<8x384xf32>
    %15 = arith.mulf %13, %14 : vector<8x384xf32>
    %16 = arith.addf %10, %15 : vector<8x384xf32>
    %17 = vector.extract_strided_slice %2 {offsets = [0, 2], sizes = [8, 1], strides = [1, 1]} : vector<8x36xf32> to vector<8x1xf32>
    %18 = vector.extract_strided_slice %4 {offsets = [2, 0], sizes = [1, 384], strides = [1, 1]} : vector<4x384xf32> to vector<1x384xf32>
    %19 = vector.broadcast %17 : vector<8x1xf32> to vector<8x384xf32>
    %20 = vector.broadcast %18 : vector<1x384xf32> to vector<8x384xf32>
    %21 = arith.mulf %19, %20 : vector<8x384xf32>
    %22 = arith.addf %16, %21 : vector<8x384xf32>
    %23 = vector.extract_strided_slice %2 {offsets = [0, 3], sizes = [8, 1], strides = [1, 1]} : vector<8x36xf32> to vector<8x1xf32>
    %24 = vector.extract_strided_slice %4 {offsets = [3, 0], sizes = [1, 384], strides = [1, 1]} : vector<4x384xf32> to vector<1x384xf32>
    %25 = vector.broadcast %23 : vector<8x1xf32> to vector<8x384xf32>
    %26 = vector.broadcast %24 : vector<1x384xf32> to vector<8x384xf32>
    %27 = arith.mulf %25, %26 : vector<8x384xf32>
    %28 = arith.addf %22, %27 : vector<8x384xf32>
    %29 = vector.extract_strided_slice %1 {offsets = [0, 1], sizes = [4, 384], strides = [1, 1]} : vector<4x512xf32> to vector<4x384xf32>
    %30 = vector.extract_strided_slice %2 {offsets = [0, 4], sizes = [8, 1], strides = [1, 1]} : vector<8x36xf32> to vector<8x1xf32>
    %31 = vector.extract_strided_slice %29 {offsets = [0, 0], sizes = [1, 384], strides = [1, 1]} : vector<4x384xf32> to vector<1x384xf32>
    %32 = vector.broadcast %30 : vector<8x1xf32> to vector<8x384xf32>
    %33 = vector.broadcast %31 : vector<1x384xf32> to vector<8x384xf32>
    %34 = arith.mulf %32, %33 : vector<8x384xf32>
    %35 = arith.addf %28, %34 : vector<8x384xf32>
    %36 = vector.extract_strided_slice %2 {offsets = [0, 5], sizes = [8, 1], strides = [1, 1]} : vector<8x36xf32> to vector<8x1xf32>
    %37 = vector.extract_strided_slice %29 {offsets = [1, 0], sizes = [1, 384], strides = [1, 1]} : vector<4x384xf32> to vector<1x384xf32>
    %38 = vector.broadcast %36 : vector<8x1xf32> to vector<8x384xf32>
    %39 = vector.broadcast %37 : vector<1x384xf32> to vector<8x384xf32>
    %40 = arith.mulf %38, %39 : vector<8x384xf32>
    %41 = arith.addf %35, %40 : vector<8x384xf32>
    %42 = vector.extract_strided_slice %2 {offsets = [0, 6], sizes = [8, 1], strides = [1, 1]} : vector<8x36xf32> to vector<8x1xf32>
    %43 = vector.extract_strided_slice %29 {offsets = [2, 0], sizes = [1, 384], strides = [1, 1]} : vector<4x384xf32> to vector<1x384xf32>
    %44 = vector.broadcast %42 : vector<8x1xf32> to vector<8x384xf32>
    %45 = vector.broadcast %43 : vector<1x384xf32> to vector<8x384xf32>
    %46 = arith.mulf %44, %45 : vector<8x384xf32>
    %47 = arith.addf %41, %46 : vector<8x384xf32>
    %48 = vector.extract_strided_slice %2 {offsets = [0, 7], sizes = [8, 1], strides = [1, 1]} : vector<8x36xf32> to vector<8x1xf32>
    %49 = vector.extract_strided_slice %29 {offsets = [3, 0], sizes = [1, 384], strides = [1, 1]} : vector<4x384xf32> to vector<1x384xf32>
    %50 = vector.broadcast %48 : vector<8x1xf32> to vector<8x384xf32>
    %51 = vector.broadcast %49 : vector<1x384xf32> to vector<8x384xf32>
    %52 = arith.mulf %50, %51 : vector<8x384xf32>
    %53 = arith.addf %47, %52 : vector<8x384xf32>
    %54 = vector.extract_strided_slice %1 {offsets = [0, 2], sizes = [4, 384], strides = [1, 1]} : vector<4x512xf32> to vector<4x384xf32>
    %55 = vector.extract_strided_slice %2 {offsets = [0, 8], sizes = [8, 1], strides = [1, 1]} : vector<8x36xf32> to vector<8x1xf32>
    %56 = vector.extract_strided_slice %54 {offsets = [0, 0], sizes = [1, 384], strides = [1, 1]} : vector<4x384xf32> to vector<1x384xf32>
    %57 = vector.broadcast %55 : vector<8x1xf32> to vector<8x384xf32>
    %58 = vector.broadcast %56 : vector<1x384xf32> to vector<8x384xf32>
    %59 = arith.mulf %57, %58 : vector<8x384xf32>
    %60 = arith.addf %53, %59 : vector<8x384xf32>
    %61 = vector.extract_strided_slice %2 {offsets = [0, 9], sizes = [8, 1], strides = [1, 1]} : vector<8x36xf32> to vector<8x1xf32>
    %62 = vector.extract_strided_slice %54 {offsets = [1, 0], sizes = [1, 384], strides = [1, 1]} : vector<4x384xf32> to vector<1x384xf32>
    %63 = vector.broadcast %61 : vector<8x1xf32> to vector<8x384xf32>
    %64 = vector.broadcast %62 : vector<1x384xf32> to vector<8x384xf32>
    %65 = arith.mulf %63, %64 : vector<8x384xf32>
    %66 = arith.addf %60, %65 : vector<8x384xf32>
    %67 = vector.extract_strided_slice %2 {offsets = [0, 10], sizes = [8, 1], strides = [1, 1]} : vector<8x36xf32> to vector<8x1xf32>
    %68 = vector.extract_strided_slice %54 {offsets = [2, 0], sizes = [1, 384], strides = [1, 1]} : vector<4x384xf32> to vector<1x384xf32>
    %69 = vector.broadcast %67 : vector<8x1xf32> to vector<8x384xf32>
    %70 = vector.broadcast %68 : vector<1x384xf32> to vector<8x384xf32>
    %71 = arith.mulf %69, %70 : vector<8x384xf32>
    %72 = arith.addf %66, %71 : vector<8x384xf32>
    %73 = vector.extract_strided_slice %2 {offsets = [0, 11], sizes = [8, 1], strides = [1, 1]} : vector<8x36xf32> to vector<8x1xf32>
    %74 = vector.extract_strided_slice %54 {offsets = [3, 0], sizes = [1, 384], strides = [1, 1]} : vector<4x384xf32> to vector<1x384xf32>
    %75 = vector.broadcast %73 : vector<8x1xf32> to vector<8x384xf32>
    %76 = vector.broadcast %74 : vector<1x384xf32> to vector<8x384xf32>
    %77 = arith.mulf %75, %76 : vector<8x384xf32>
    %78 = arith.addf %72, %77 : vector<8x384xf32>
    %79 = vector.extract_strided_slice %1 {offsets = [0, 18], sizes = [4, 384], strides = [1, 1]} : vector<4x512xf32> to vector<4x384xf32>
    %80 = vector.extract_strided_slice %2 {offsets = [0, 12], sizes = [8, 1], strides = [1, 1]} : vector<8x36xf32> to vector<8x1xf32>
    %81 = vector.extract_strided_slice %79 {offsets = [0, 0], sizes = [1, 384], strides = [1, 1]} : vector<4x384xf32> to vector<1x384xf32>
    %82 = vector.broadcast %80 : vector<8x1xf32> to vector<8x384xf32>
    %83 = vector.broadcast %81 : vector<1x384xf32> to vector<8x384xf32>
    %84 = arith.mulf %82, %83 : vector<8x384xf32>
    %85 = arith.addf %78, %84 : vector<8x384xf32>
    %86 = vector.extract_strided_slice %2 {offsets = [0, 13], sizes = [8, 1], strides = [1, 1]} : vector<8x36xf32> to vector<8x1xf32>
    %87 = vector.extract_strided_slice %79 {offsets = [1, 0], sizes = [1, 384], strides = [1, 1]} : vector<4x384xf32> to vector<1x384xf32>
    %88 = vector.broadcast %86 : vector<8x1xf32> to vector<8x384xf32>
    %89 = vector.broadcast %87 : vector<1x384xf32> to vector<8x384xf32>
    %90 = arith.mulf %88, %89 : vector<8x384xf32>
    %91 = arith.addf %85, %90 : vector<8x384xf32>
    %92 = vector.extract_strided_slice %2 {offsets = [0, 14], sizes = [8, 1], strides = [1, 1]} : vector<8x36xf32> to vector<8x1xf32>
    %93 = vector.extract_strided_slice %79 {offsets = [2, 0], sizes = [1, 384], strides = [1, 1]} : vector<4x384xf32> to vector<1x384xf32>
    %94 = vector.broadcast %92 : vector<8x1xf32> to vector<8x384xf32>
    %95 = vector.broadcast %93 : vector<1x384xf32> to vector<8x384xf32>
    %96 = arith.mulf %94, %95 : vector<8x384xf32>
    %97 = arith.addf %91, %96 : vector<8x384xf32>
    %98 = vector.extract_strided_slice %2 {offsets = [0, 15], sizes = [8, 1], strides = [1, 1]} : vector<8x36xf32> to vector<8x1xf32>
    %99 = vector.extract_strided_slice %79 {offsets = [3, 0], sizes = [1, 384], strides = [1, 1]} : vector<4x384xf32> to vector<1x384xf32>
    %100 = vector.broadcast %98 : vector<8x1xf32> to vector<8x384xf32>
    %101 = vector.broadcast %99 : vector<1x384xf32> to vector<8x384xf32>
    %102 = arith.mulf %100, %101 : vector<8x384xf32>
    %103 = arith.addf %97, %102 : vector<8x384xf32>
    %104 = vector.extract_strided_slice %1 {offsets = [0, 19], sizes = [4, 384], strides = [1, 1]} : vector<4x512xf32> to vector<4x384xf32>
    %105 = vector.extract_strided_slice %2 {offsets = [0, 16], sizes = [8, 1], strides = [1, 1]} : vector<8x36xf32> to vector<8x1xf32>
    %106 = vector.extract_strided_slice %104 {offsets = [0, 0], sizes = [1, 384], strides = [1, 1]} : vector<4x384xf32> to vector<1x384xf32>
    %107 = vector.broadcast %105 : vector<8x1xf32> to vector<8x384xf32>
    %108 = vector.broadcast %106 : vector<1x384xf32> to vector<8x384xf32>
    %109 = arith.mulf %107, %108 : vector<8x384xf32>
    %110 = arith.addf %103, %109 : vector<8x384xf32>
    %111 = vector.extract_strided_slice %2 {offsets = [0, 17], sizes = [8, 1], strides = [1, 1]} : vector<8x36xf32> to vector<8x1xf32>
    %112 = vector.extract_strided_slice %104 {offsets = [1, 0], sizes = [1, 384], strides = [1, 1]} : vector<4x384xf32> to vector<1x384xf32>
    %113 = vector.broadcast %111 : vector<8x1xf32> to vector<8x384xf32>
    %114 = vector.broadcast %112 : vector<1x384xf32> to vector<8x384xf32>
    %115 = arith.mulf %113, %114 : vector<8x384xf32>
    %116 = arith.addf %110, %115 : vector<8x384xf32>
    %117 = vector.extract_strided_slice %2 {offsets = [0, 18], sizes = [8, 1], strides = [1, 1]} : vector<8x36xf32> to vector<8x1xf32>
    %118 = vector.extract_strided_slice %104 {offsets = [2, 0], sizes = [1, 384], strides = [1, 1]} : vector<4x384xf32> to vector<1x384xf32>
    %119 = vector.broadcast %117 : vector<8x1xf32> to vector<8x384xf32>
    %120 = vector.broadcast %118 : vector<1x384xf32> to vector<8x384xf32>
    %121 = arith.mulf %119, %120 : vector<8x384xf32>
    %122 = arith.addf %116, %121 : vector<8x384xf32>
    %123 = vector.extract_strided_slice %2 {offsets = [0, 19], sizes = [8, 1], strides = [1, 1]} : vector<8x36xf32> to vector<8x1xf32>
    %124 = vector.extract_strided_slice %104 {offsets = [3, 0], sizes = [1, 384], strides = [1, 1]} : vector<4x384xf32> to vector<1x384xf32>
    %125 = vector.broadcast %123 : vector<8x1xf32> to vector<8x384xf32>
    %126 = vector.broadcast %124 : vector<1x384xf32> to vector<8x384xf32>
    %127 = arith.mulf %125, %126 : vector<8x384xf32>
    %128 = arith.addf %122, %127 : vector<8x384xf32>
    %129 = vector.extract_strided_slice %1 {offsets = [0, 20], sizes = [4, 384], strides = [1, 1]} : vector<4x512xf32> to vector<4x384xf32>
    %130 = vector.extract_strided_slice %2 {offsets = [0, 20], sizes = [8, 1], strides = [1, 1]} : vector<8x36xf32> to vector<8x1xf32>
    %131 = vector.extract_strided_slice %129 {offsets = [0, 0], sizes = [1, 384], strides = [1, 1]} : vector<4x384xf32> to vector<1x384xf32>
    %132 = vector.broadcast %130 : vector<8x1xf32> to vector<8x384xf32>
    %133 = vector.broadcast %131 : vector<1x384xf32> to vector<8x384xf32>
    %134 = arith.mulf %132, %133 : vector<8x384xf32>
    %135 = arith.addf %128, %134 : vector<8x384xf32>
    %136 = vector.extract_strided_slice %2 {offsets = [0, 21], sizes = [8, 1], strides = [1, 1]} : vector<8x36xf32> to vector<8x1xf32>
    %137 = vector.extract_strided_slice %129 {offsets = [1, 0], sizes = [1, 384], strides = [1, 1]} : vector<4x384xf32> to vector<1x384xf32>
    %138 = vector.broadcast %136 : vector<8x1xf32> to vector<8x384xf32>
    %139 = vector.broadcast %137 : vector<1x384xf32> to vector<8x384xf32>
    %140 = arith.mulf %138, %139 : vector<8x384xf32>
    %141 = arith.addf %135, %140 : vector<8x384xf32>
    %142 = vector.extract_strided_slice %2 {offsets = [0, 22], sizes = [8, 1], strides = [1, 1]} : vector<8x36xf32> to vector<8x1xf32>
    %143 = vector.extract_strided_slice %129 {offsets = [2, 0], sizes = [1, 384], strides = [1, 1]} : vector<4x384xf32> to vector<1x384xf32>
    %144 = vector.broadcast %142 : vector<8x1xf32> to vector<8x384xf32>
    %145 = vector.broadcast %143 : vector<1x384xf32> to vector<8x384xf32>
    %146 = arith.mulf %144, %145 : vector<8x384xf32>
    %147 = arith.addf %141, %146 : vector<8x384xf32>
    %148 = vector.extract_strided_slice %2 {offsets = [0, 23], sizes = [8, 1], strides = [1, 1]} : vector<8x36xf32> to vector<8x1xf32>
    %149 = vector.extract_strided_slice %129 {offsets = [3, 0], sizes = [1, 384], strides = [1, 1]} : vector<4x384xf32> to vector<1x384xf32>
    %150 = vector.broadcast %148 : vector<8x1xf32> to vector<8x384xf32>
    %151 = vector.broadcast %149 : vector<1x384xf32> to vector<8x384xf32>
    %152 = arith.mulf %150, %151 : vector<8x384xf32>
    %153 = arith.addf %147, %152 : vector<8x384xf32>
    %154 = vector.extract_strided_slice %1 {offsets = [0, 36], sizes = [4, 384], strides = [1, 1]} : vector<4x512xf32> to vector<4x384xf32>
    %155 = vector.extract_strided_slice %2 {offsets = [0, 24], sizes = [8, 1], strides = [1, 1]} : vector<8x36xf32> to vector<8x1xf32>
    %156 = vector.extract_strided_slice %154 {offsets = [0, 0], sizes = [1, 384], strides = [1, 1]} : vector<4x384xf32> to vector<1x384xf32>
    %157 = vector.broadcast %155 : vector<8x1xf32> to vector<8x384xf32>
    %158 = vector.broadcast %156 : vector<1x384xf32> to vector<8x384xf32>
    %159 = arith.mulf %157, %158 : vector<8x384xf32>
    %160 = arith.addf %153, %159 : vector<8x384xf32>
    %161 = vector.extract_strided_slice %2 {offsets = [0, 25], sizes = [8, 1], strides = [1, 1]} : vector<8x36xf32> to vector<8x1xf32>
    %162 = vector.extract_strided_slice %154 {offsets = [1, 0], sizes = [1, 384], strides = [1, 1]} : vector<4x384xf32> to vector<1x384xf32>
    %163 = vector.broadcast %161 : vector<8x1xf32> to vector<8x384xf32>
    %164 = vector.broadcast %162 : vector<1x384xf32> to vector<8x384xf32>
    %165 = arith.mulf %163, %164 : vector<8x384xf32>
    %166 = arith.addf %160, %165 : vector<8x384xf32>
    %167 = vector.extract_strided_slice %2 {offsets = [0, 26], sizes = [8, 1], strides = [1, 1]} : vector<8x36xf32> to vector<8x1xf32>
    %168 = vector.extract_strided_slice %154 {offsets = [2, 0], sizes = [1, 384], strides = [1, 1]} : vector<4x384xf32> to vector<1x384xf32>
    %169 = vector.broadcast %167 : vector<8x1xf32> to vector<8x384xf32>
    %170 = vector.broadcast %168 : vector<1x384xf32> to vector<8x384xf32>
    %171 = arith.mulf %169, %170 : vector<8x384xf32>
    %172 = arith.addf %166, %171 : vector<8x384xf32>
    %173 = vector.extract_strided_slice %2 {offsets = [0, 27], sizes = [8, 1], strides = [1, 1]} : vector<8x36xf32> to vector<8x1xf32>
    %174 = vector.extract_strided_slice %154 {offsets = [3, 0], sizes = [1, 384], strides = [1, 1]} : vector<4x384xf32> to vector<1x384xf32>
    %175 = vector.broadcast %173 : vector<8x1xf32> to vector<8x384xf32>
    %176 = vector.broadcast %174 : vector<1x384xf32> to vector<8x384xf32>
    %177 = arith.mulf %175, %176 : vector<8x384xf32>
    %178 = arith.addf %172, %177 : vector<8x384xf32>
    %179 = vector.extract_strided_slice %1 {offsets = [0, 37], sizes = [4, 384], strides = [1, 1]} : vector<4x512xf32> to vector<4x384xf32>
    %180 = vector.extract_strided_slice %2 {offsets = [0, 28], sizes = [8, 1], strides = [1, 1]} : vector<8x36xf32> to vector<8x1xf32>
    %181 = vector.extract_strided_slice %179 {offsets = [0, 0], sizes = [1, 384], strides = [1, 1]} : vector<4x384xf32> to vector<1x384xf32>
    %182 = vector.broadcast %180 : vector<8x1xf32> to vector<8x384xf32>
    %183 = vector.broadcast %181 : vector<1x384xf32> to vector<8x384xf32>
    %184 = arith.mulf %182, %183 : vector<8x384xf32>
    %185 = arith.addf %178, %184 : vector<8x384xf32>
    %186 = vector.extract_strided_slice %2 {offsets = [0, 29], sizes = [8, 1], strides = [1, 1]} : vector<8x36xf32> to vector<8x1xf32>
    %187 = vector.extract_strided_slice %179 {offsets = [1, 0], sizes = [1, 384], strides = [1, 1]} : vector<4x384xf32> to vector<1x384xf32>
    %188 = vector.broadcast %186 : vector<8x1xf32> to vector<8x384xf32>
    %189 = vector.broadcast %187 : vector<1x384xf32> to vector<8x384xf32>
    %190 = arith.mulf %188, %189 : vector<8x384xf32>
    %191 = arith.addf %185, %190 : vector<8x384xf32>
    %192 = vector.extract_strided_slice %2 {offsets = [0, 30], sizes = [8, 1], strides = [1, 1]} : vector<8x36xf32> to vector<8x1xf32>
    %193 = vector.extract_strided_slice %179 {offsets = [2, 0], sizes = [1, 384], strides = [1, 1]} : vector<4x384xf32> to vector<1x384xf32>
    %194 = vector.broadcast %192 : vector<8x1xf32> to vector<8x384xf32>
    %195 = vector.broadcast %193 : vector<1x384xf32> to vector<8x384xf32>
    %196 = arith.mulf %194, %195 : vector<8x384xf32>
    %197 = arith.addf %191, %196 : vector<8x384xf32>
    %198 = vector.extract_strided_slice %2 {offsets = [0, 31], sizes = [8, 1], strides = [1, 1]} : vector<8x36xf32> to vector<8x1xf32>
    %199 = vector.extract_strided_slice %179 {offsets = [3, 0], sizes = [1, 384], strides = [1, 1]} : vector<4x384xf32> to vector<1x384xf32>
    %200 = vector.broadcast %198 : vector<8x1xf32> to vector<8x384xf32>
    %201 = vector.broadcast %199 : vector<1x384xf32> to vector<8x384xf32>
    %202 = arith.mulf %200, %201 : vector<8x384xf32>
    %203 = arith.addf %197, %202 : vector<8x384xf32>
    %204 = vector.extract_strided_slice %1 {offsets = [0, 38], sizes = [4, 384], strides = [1, 1]} : vector<4x512xf32> to vector<4x384xf32>
    %205 = vector.extract_strided_slice %2 {offsets = [0, 32], sizes = [8, 1], strides = [1, 1]} : vector<8x36xf32> to vector<8x1xf32>
    %206 = vector.extract_strided_slice %204 {offsets = [0, 0], sizes = [1, 384], strides = [1, 1]} : vector<4x384xf32> to vector<1x384xf32>
    %207 = vector.broadcast %205 : vector<8x1xf32> to vector<8x384xf32>
    %208 = vector.broadcast %206 : vector<1x384xf32> to vector<8x384xf32>
    %209 = arith.mulf %207, %208 : vector<8x384xf32>
    %210 = arith.addf %203, %209 : vector<8x384xf32>
    %211 = vector.extract_strided_slice %2 {offsets = [0, 33], sizes = [8, 1], strides = [1, 1]} : vector<8x36xf32> to vector<8x1xf32>
    %212 = vector.extract_strided_slice %204 {offsets = [1, 0], sizes = [1, 384], strides = [1, 1]} : vector<4x384xf32> to vector<1x384xf32>
    %213 = vector.broadcast %211 : vector<8x1xf32> to vector<8x384xf32>
    %214 = vector.broadcast %212 : vector<1x384xf32> to vector<8x384xf32>
    %215 = arith.mulf %213, %214 : vector<8x384xf32>
    %216 = arith.addf %210, %215 : vector<8x384xf32>
    %217 = vector.extract_strided_slice %2 {offsets = [0, 34], sizes = [8, 1], strides = [1, 1]} : vector<8x36xf32> to vector<8x1xf32>
    %218 = vector.extract_strided_slice %204 {offsets = [2, 0], sizes = [1, 384], strides = [1, 1]} : vector<4x384xf32> to vector<1x384xf32>
    %219 = vector.broadcast %217 : vector<8x1xf32> to vector<8x384xf32>
    %220 = vector.broadcast %218 : vector<1x384xf32> to vector<8x384xf32>
    %221 = arith.mulf %219, %220 : vector<8x384xf32>
    %222 = arith.addf %216, %221 : vector<8x384xf32>
    %223 = vector.extract_strided_slice %2 {offsets = [0, 35], sizes = [8, 1], strides = [1, 1]} : vector<8x36xf32> to vector<8x1xf32>
    %224 = vector.extract_strided_slice %204 {offsets = [3, 0], sizes = [1, 384], strides = [1, 1]} : vector<4x384xf32> to vector<1x384xf32>
    %225 = vector.broadcast %223 : vector<8x1xf32> to vector<8x384xf32>
    %226 = vector.broadcast %224 : vector<1x384xf32> to vector<8x384xf32>
    %227 = arith.mulf %225, %226 : vector<8x384xf32>
    %228 = arith.addf %222, %227 : vector<8x384xf32>
    %c0_4 = arith.constant 0 : index
    %c0_5 = arith.constant 0 : index
    %c0_6 = arith.constant 0 : index
    %229 = vector.load %arg4[%c0_4, %c0_5, %c0_6] : memref<1x8x384xf32, #tpu.memory_space<vmem>>, vector<1x8x384xf32>
    %230 = vector.shape_cast %229 : vector<1x8x384xf32> to vector<8x384xf32>
    %231 = vector.shape_cast %228 : vector<8x384xf32> to vector<1x8x384xf32>
    tpu.vector_store %arg4[%c0_4, %c0_5, %c0_6], %231 {strides = array<i32>} : memref<1x8x384xf32, #tpu.memory_space<vmem>>, vector<1x8x384xf32>,
    %c0_7 = arith.constant 0 : index
    %c0_8 = arith.constant 0 : index
    %232 = vector.load %arg3[%c0_7, %c0_8] : memref<1x384xf32, #tpu.memory_space<vmem>>, vector<1x384xf32>
    %233 = vector.broadcast %232 : vector<1x384xf32> to vector<8x384xf32>
    %234 = arith.mulf %228, %233 : vector<8x384xf32>
    %cst_9 = arith.constant dense<0.000000e+00> : vector<8xf32>
    %235 = vector.multi_reduction <add>, %234, %cst_9 [1] : vector<8x384xf32> to vector<8xf32>
    %236 = vector.shape_cast %235 : vector<8xf32> to vector<8x1xf32>
    %c0_10 = arith.constant 0 : index
    %c0_11 = arith.constant 0 : index
    %c0_12 = arith.constant 0 : index
    %237 = vector.load %arg5[%c0_10, %c0_11, %c0_12] : memref<1x8x1xf32, #tpu.memory_space<vmem>>, vector<1x8x1xf32>
    %238 = vector.shape_cast %237 : vector<1x8x1xf32> to vector<8x1xf32>
    %239 = vector.shape_cast %236 : vector<8x1xf32> to vector<1x8x1xf32>
    tpu.vector_store %arg5[%c0_10, %c0_11, %c0_12], %239 {strides = array<i32>} : memref<1x8x1xf32, #tpu.memory_space<vmem>>, vector<1x8x1xf32>,
    %240 = arith.mulf %234, %234 : vector<8x384xf32>
    %cst_13 = arith.constant dense<0.000000e+00> : vector<8xf32>
    %241 = vector.multi_reduction <add>, %240, %cst_13 [1] : vector<8x384xf32> to vector<8xf32>
    %242 = vector.shape_cast %241 : vector<8xf32> to vector<8x1xf32>
    %c0_14 = arith.constant 0 : index
    %c0_15 = arith.constant 0 : index
    %c0_16 = arith.constant 0 : index
    %243 = vector.load %arg6[%c0_14, %c0_15, %c0_16] : memref<1x8x1xf32, #tpu.memory_space<vmem>>, vector<1x8x1xf32>
    %244 = vector.shape_cast %243 : vector<1x8x1xf32> to vector<8x1xf32>
    %245 = vector.shape_cast %242 : vector<8x1xf32> to vector<1x8x1xf32>
    tpu.vector_store %arg6[%c0_14, %c0_15, %c0_16], %245 {strides = array<i32>} : memref<1x8x1xf32, #tpu.memory_space<vmem>>, vector<1x8x1xf32>,
    return
  }
  func.func @transform_0(%arg0: i32) -> (i32, i32, i32) {
    %c0_i32 = arith.constant 0 : i32
    %c0_i32_0 = arith.constant 0 : i32
    %c0_i32_1 = arith.constant 0 : i32
    return %arg0, %c0_i32, %c0_i32_0 : i32, i32, i32
  }
  func.func @transform_1(%arg0: i32) -> (i32, i32) {
    %c0_i32 = arith.constant 0 : i32
    %c0_i32_0 = arith.constant 0 : i32
    %c0_i32_1 = arith.constant 0 : i32
    return %c0_i32, %c0_i32_0 : i32, i32
  }
  func.func @transform_2(%arg0: i32) -> (i32, i32) {
    %c0_i32 = arith.constant 0 : i32
    %c0_i32_0 = arith.constant 0 : i32
    %c0_i32_1 = arith.constant 0 : i32
    return %c0_i32, %c0_i32_0 : i32, i32
  }
  func.func @transform_3(%arg0: i32) -> (i32, i32, i32) {
    %c0_i32 = arith.constant 0 : i32
    %c0_i32_0 = arith.constant 0 : i32
    %c0_i32_1 = arith.constant 0 : i32
    return %arg0, %c0_i32, %c0_i32_0 : i32, i32, i32
  }
  func.func @transform_4(%arg0: i32) -> (i32, i32, i32) {
    %c0_i32 = arith.constant 0 : i32
    %c0_i32_0 = arith.constant 0 : i32
    %c0_i32_1 = arith.constant 0 : i32
    return %arg0, %c0_i32, %c0_i32_0 : i32, i32, i32
  }
  func.func @transform_5(%arg0: i32) -> (i32, i32, i32) {
    %c0_i32 = arith.constant 0 : i32
    %c0_i32_0 = arith.constant 0 : i32
    %c0_i32_1 = arith.constant 0 : i32
    return %arg0, %c0_i32, %c0_i32_0 : i32, i32, i32
  }
}

</mosaic_0001>

<bundles_post_ra>
// kernel: conv_bn_bias2.3
= control target key start
LH: loop header
LB: loop body
LE: loop exit
PB: predicated region body
PF: predicated region fallthrough
CT: control target
= control target key end

     0   :  { %s299_s12 = smov 0   ;;  %s322_s0 = inlined_call_operand.vmem [shape: f32[2,8,384], index: 0, kind: input, shape index: {}]   ;;  %s323_s1 = inlined_call_operand.vmem [shape: f32[8,1], index: 1, kind: input, shape index: {}]   ;;  %s324_s2 = inlined_call_operand.vmem [shape: f32[8,1], index: 2, kind: input, shape index: {}]   ;;  %s325_s3 = inlined_call_operand.vmem [shape: f32[2,8,384], index: 3, kind: output, shape index: {}]  }
   0x1 LB: > { %s250_s13 = sadd.s32 4294967295, %s276_s12   ;;  %p254_p0 = scmp.ge.s32.totalorder %s276_s12, 1  ;;  %s276_s12 = sphi %s299_s12, %s13_s12  }
   0x2   : > { %p137_p1 = scmp.lt.s32.totalorder %s276_s12, 3 }
   0x4   : > { %p138_p2 = pnand %p254_p0, %p137_p1 }
   0x5   : > { %p161_p3 = scmp.lt.s32.totalorder (!%p138_p2), %s250_s13, 1 }
   0x6   : > { %141 = sbr.rel (%p138_p2) target bundleno = 141 (0x8d), region = 32 }
   0xb   : > { %v174_v0 = vld [vmem:[%s323_s1] sm:$0xff]  ;;  %v278_v1 = vmov 0   ;;  %s327_s13 = smov (!%p161_p3, %s250_s13), 1 }
   0xc   : > { %269 = vset.pattern.permute.xlu0 %v278_v1  ;;  %v183_v2 = vld [vmem:[%s324_s2] sm:$0xff]  ;;  %s259_s18 = smul.u32 24, %s327_s13 }
   0xd   : > { %177 = vperm.xlu0 %269, %v174_v0  }
   0xe   : > { %s165_s21 = scalar_lea.vmem %s322_s0, %s259_s18  ;;  %s170_s24 = scalar_lea.vmem %s325_s3, %s259_s18 }
   0xf   : > { %v171_v4 = vld [vmem:[%s165_s21] sm:$0xff]  ;;  %v172_v5 = vld [vmem:[%s165_s21 + $0x8] sm:$0xff]  ;;  %v173_v6 = vld [vmem:[%s165_s21 + $0x10] sm:$0xff] }
  0x15   : > { %186 = vperm.xlu0 %269, %v183_v2  }
  0x7f   : > { %v178_v3 = vpop.permute.xlu0 %177 }
  0x80   : > { %v180_v7 = vmul.f32 %v178_v3, %v171_v4  ;;  %v181_v8 = vmul.f32 %v178_v3, %v172_v5  ;;  %v182_v9 = vmul.f32 %v178_v3, %v173_v6 }
  0x87   : > { %v187_v10 = vpop.permute.xlu0 %186 }
  0x88   : > { %v189_v11 = vadd.f32 %v187_v10, %v180_v7  ;;  %v190_v12 = vadd.f32 %v187_v10, %v181_v8  ;;  %v191_v13 = vadd.f32 %v187_v10, %v182_v9 }
  0x8a   : > { %192 = vst [vmem:[%s170_s24] sm:$0xff] %v189_v11 }
  0x8b   : > { %193 = vst [vmem:[%s170_s24 + $0x8] sm:$0xff] %v190_v12 }
  0x8c   : > { %194 = vst [vmem:[%s170_s24 + $0x10] sm:$0xff] %v191_v13 }
  0x8d PF: > { %s13_s12 = sadd.s32 1, %s276_s12  }
  0x8e   : > { %p10_p4 = scmp.ge.s32.totalorder %s13_s12, 4  }
  0x90   :  { %12 = sbr.rel (!%p10_p4) target bundleno = 1 (0x1), region = 62 }

// kernel: conv_bn_bias2.2
= control target key start
LH: loop header
LB: loop body
LE: loop exit
PB: predicated region body
PF: predicated region fallthrough
CT: control target
= control target key end

     0   :  { %s1607_s18 = smov 0   ;;  %s2218_s0 = inlined_call_operand.vmem [shape: f32[2,4,512], index: 0, kind: input, shape index: {}]   ;;  %s2219_s1 = inlined_call_operand.vmem [shape: f32[8,36], index: 1, kind: input, shape index: {}]   ;;  %s2220_s2 = inlined_call_operand.vmem [shape: f32[1,384], index: 2, kind: input, shape index: {}]   ;;  %s2221_s3 = inlined_call_operand.vmem [shape: f32[2,8,384], index: 3, kind: output, shape index: {0}]   ;;  %s2222_s4 = inlined_call_operand.vmem [shape: f32[2,8,1], index: 4, kind: output, shape index: {1}]   ;;  %s2223_s5 = inlined_call_operand.vmem [shape: f32[2,8,1], index: 5, kind: output, shape index: {2}]  }
   0x1 LB: > { %s1421_s19 = sadd.s32 4294967295, %s1531_s18   ;;  %p1425_p0 = scmp.ge.s32.totalorder %s1531_s18, 1  ;;  %s1531_s18 = sphi %s1607_s18, %s16_s18  }
   0x2   : > { %p192_p1 = scmp.lt.s32.totalorder %s1531_s18, 3 }
   0x4   : > { %p193_p2 = pnand %p1425_p0, %p192_p1 }
   0x5   : > { %p228_p3 = scmp.lt.s32.totalorder (!%p193_p2), %s1421_s19, 1  ;;  %s1544_s26 = smov (!%p193_p2), 127  }
   0x6   : > { %196 = sbr.rel (%p193_p2) target bundleno = 978 (0x3d2), region = 32  ;;  %s1549_s27 = smov (!%p193_p2), 126  }
   0x7   : > { %s1557_s28 = smov (!%p193_p2), 110   ;;  %s1562_s29 = smov (!%p193_p2), 109  }
   0x8   : > { %s1567_s30 = smov (!%p193_p2), 108   ;;  %s1568_s6 = smov (!%p193_p2), 92  }
   0x9   : > { %s1572_s9 = smov (!%p193_p2), 91   ;;  %s1576_s10 = smov (!%p193_p2), 90  }
   0xb   : > { %v1618_v0 = vld [vmem:[%s2219_s1] sm:$0xff]  ;;  %v1533_v1 = vmov 4   ;;  %v1534_v2 = vmov 2   ;;  %v1535_v3 = vmov 0   ;;  %v1536_v4 = vmov 3   ;;  %s2225_s19 = smov (!%p228_p3, %s1421_s19), 1 }
   0xc   : > { %1491 = vset.pattern.permute.xlu2 %v1533_v1  ;;  %1489 = vset.pattern.permute.xlu1 %v1534_v2  ;;  %v1537_v5 = vmov 1   ;;  %v1538_v6 = vmov 5   ;;  %v1539_v7 = vmov 6   ;;  %v1540_v8 = vmov 7   ;;  %s1433_s22 = sshll.u32 %s2225_s19, 4  ;;  %s1434_s13 = smul.u32 24, %s2225_s19 }
   0xd   : > { %1487 = vset.pattern.permute.xlu0 %v1535_v3  ;;  %329 = vperm.xlu2 %1491, %v1618_v0   ;;  %v1541_v9 = vmov 8   ;;  %v1542_v10 = vmov 9   ;;  %v1543_v11 = vmov 10   ;;  %s232_s25 = scalar_lea.vmem %s2218_s0, %s1433_s22  ;;  %v1545_v27 = vmov 11   ;;  %s1429_s17 = sshll.u32 %s2225_s19, 3 }
   0xe   : > { %291 = vperm.xlu1 %1489, %v1618_v0   ;;  %251 = vperm.xlu0 %1487, %v1618_v0   ;;  %v1641_v12 = vld [vmem:[%s232_s25 + $0x8] sm:$0xff]  ;;  %v1643_v13 = vld [vmem:[%s232_s25] sm:$0xff]  ;;  %v1546_v3 = vmov 12   ;;  %vm351_vm0 = vcmask 1039360   ;;  %vm477_vm1 = vcmask 1031168   ;;  %vm594_vm2 = vcmask 900096   ;;  %s237_s16 = scalar_lea.vmem %s2221_s3, %s1434_s13  ;;  %s241_s22 = scalar_lea.vmem %s2222_s4, %s1429_s17 }
   0xf   : > { %v332_v14 = vperm.slane %v1641_v12, 4  ;;  %v257_v15 = vperm.slane %v1643_v13, 4  ;;  %v256_v16 = vperm.slane %v1643_v13, 0  ;;  %v258_v21 = vperm.slane %v1641_v12, 0  ;;  %s245_s25 = scalar_lea.vmem %s2223_s5, %s1429_s17 }
  0x10   : > { %v275_v30 = vperm.slane %v1643_v13, 1  ;;  %v276_v31 = vperm.slane %v1643_v13, 5  ;;  %v277_v32 = vperm.slane %v1641_v12, 1  ;;  %v294_v48 = vperm.slane %v1643_v13, 2 }
  0x11   : > { %v1648_v17 = vperm.slane %v332_v14, 0  ;;  %v1650_v18 = vperm.slane %v257_v15, 0  ;;  %v1652_v19 = vperm.slane %v256_v16, 0  ;;  %v1661_v25 = vperm.slane %v258_v21, 0 }
  0x12   : > { %v1670_v33 = vperm.slane %v275_v30, 1  ;;  %v1672_v34 = vperm.slane %v276_v31, 1  ;;  %v1674_v35 = vperm.slane %v277_v32, 1  ;;  %v365_v52 = vperm.slane %v1641_v12, 5 }
  0x13   : > { %v1698_v54 = vperm.slane %v294_v48, 2  ;;  %v296_v57 = vperm.slane %v1641_v12, 2  ;;  %v295_v58 = vperm.slane %v1643_v13, 6  ;;  %v397_v1 = vperm.slane %v1641_v12, 6 }
  0x14   : > { %v1700_v55 = vperm.slane %v365_v52, 1  ;;  %v313_v2 = vperm.slane %v1643_v13, 3  ;;  %v429_v21 = vperm.slane %v1641_v12, 7  ;;  %v1551_v32 = vmov 16  }
  0x15   : > { %v1709_v60 = vperm.slane %v296_v57, 2  ;;  %v1711_v61 = vperm.slane %v295_v58, 2  ;;  %v1552_v48 = vmov 17   ;;  %vm711_vm3 = vcmask 891904  }
  0x16   : > { %1490 = vset.pattern.permute.xlu1 %v1536_v4  ;;  %1488 = vset.pattern.permute.xlu0 %v1537_v5  ;;  %v1720_v5 = vperm.slane %v397_v1, 2  ;;  %v1554_v1 = vmov 19   ;;  %vm828_vm4 = vcmask 883712   ;;  %vm945_vm5 = vcmask 752640  }
  0x17   : > { %310 = vperm.xlu1 %1490, %v1618_v0   ;;  %272 = vperm.xlu0 %1488, %v1618_v0   ;;  %vm1062_vm6 = vcmask 744448   ;;  %vm1179_vm7 = vcmask 736256   ;;  %vm1294_vm8 = vcmask 7168  }
  0x1f   : > { %1492 = vset.pattern.permute.xlu1 %v1538_v6  ;;  %1493 = vset.pattern.permute.xlu0 %v1539_v7  ;;  %v1722_v6 = vperm.slane %v313_v2, 3 }
  0x20   : > { %362 = vperm.xlu1 %1492, %v1618_v0   ;;  %394 = vperm.xlu0 %1493, %v1618_v0  }
  0x28   : > { %1494 = vset.pattern.permute.xlu0 %v1540_v8 }
  0x29   : > { %426 = vperm.xlu0 %1494, %v1618_v0  }
  0x31   : > { %1495 = vset.pattern.permute.xlu0 %v1541_v9  ;;  %v315_v9 = vperm.slane %v1641_v12, 3  ;;  %v1550_v12 = vmov 15  }
  0x32   : > { %458 = vperm.xlu0 %1495, %v1618_v0  }
  0x33   : > { %v1730_v14 = vperm.slane %v315_v9, 3 }
  0x3a   : > { %1496 = vset.pattern.permute.xlu0 %v1542_v10  ;;  %v314_v10 = vperm.slane %v1643_v13, 7 }
  0x3b   : > { %488 = vperm.xlu0 %1496, %v1618_v0  }
  0x3c   : > { %v1733_v15 = vperm.slane %v314_v10, 3 }
  0x43   : > { %1497 = vset.pattern.permute.xlu0 %v1543_v11  ;;  %v1547_v11 = vmov 13  }
  0x44   : > { %517 = vperm.xlu0 %1497, %v1618_v0  }
  0x4c   : > { %1498 = vset.pattern.permute.xlu0 %v1545_v27 }
  0x67   : > { %v330_v20 = vpop.permute.xlu2 %329 }
  0x68   : > { %v338_v22 = vmul.f32 %v1648_v17, %v330_v20  ;;  %v336_v23 = vmul.f32 %v330_v20, %v1650_v18  ;;  %v335_v24 = vmul.f32 %v330_v20, %v1652_v19  ;;  %v337_v26 = vmul.f32 %v330_v20, %v1661_v25 }
  0x6a   : > { %349 = vrot.lane.b32.xlu0 %v338_v22, %s1544_s26  ;;  %345 = vrot.lane.b32.xlu1 %v336_v23, %s1544_s26  ;;  %v1740_v22 = vperm.slane %v429_v21, 3  ;;  %v1548_v23 = vmov 14  }
  0x6b   : > { %343 = vrot.lane.b32.xlu2 %v335_v24, %s1544_s26 }
  0x73   : > { %347 = vrot.lane.b32.xlu2 %v337_v26, %s1544_s26 }
  0x80   : > { %v1665_v28 = vpop.permute.xlu1 %291  ;;  %v252_v29 = vpop.permute.xlu0 %251 }
  0x81   : > { %v265_v36 = vmul.f32 %v1652_v19, %v252_v29  ;;  %v266_v37 = vmul.f32 %v1650_v18, %v252_v29  ;;  %v267_v38 = vmul.f32 %v1661_v25, %v252_v29  ;;  %v303_v2 = vmul.f32 %v1698_v54, %v1665_v28 }
  0x89   : > { %v1679_v39 = vpop.permute.xlu1 %310  ;;  %v273_v40 = vpop.permute.xlu0 %272 }
  0x8a   : > { %v284_v41 = vmul.f32 %v1670_v33, %v273_v40  ;;  %v285_v42 = vmul.f32 %v1672_v34, %v273_v40  ;;  %v286_v43 = vmul.f32 %v1674_v35, %v273_v40  ;;  %v322_v10 = vmul.f32 %v1722_v6, %v1679_v39 }
  0x8c   : > { %v1684_v44 = vadd.f32 %v284_v41, %v265_v36  ;;  %v1686_v45 = vadd.f32 %v285_v42, %v266_v37  ;;  %v1688_v46 = vadd.f32 %v286_v43, %v267_v38  ;;  %v305_v42 = vmul.f32 %v1709_v60, %v1665_v28 }
  0x8e   : > { %v308_v43 = vadd.f32 %v305_v42, %v1688_v46 }
  0x92   : > { %v363_v47 = vpop.permute.xlu1 %362  ;;  %v395_v53 = vpop.permute.xlu0 %394 }
  0x93   : > { %v369_v49 = vmul.f32 %v363_v47, %v1672_v34  ;;  %v370_v50 = vmul.f32 %v363_v47, %v1674_v35  ;;  %v368_v51 = vmul.f32 %v363_v47, %v1670_v33  ;;  %v400_v56 = vmul.f32 %v395_v53, %v1698_v54 }
  0x94   : > { %v371_v59 = vmul.f32 %v1700_v55, %v363_v47  ;;  %v402_v62 = vmul.f32 %v395_v53, %v1709_v60  ;;  %v401_v63 = vmul.f32 %v395_v53, %v1711_v61  ;;  %v403_v8 = vmul.f32 %v1720_v5, %v395_v53 }
  0x95   : > { %378 = vrot.lane.b32.xlu0 %v369_v49, %s1544_s26  ;;  %380 = vrot.lane.b32.xlu1 %v370_v50, %s1544_s26  ;;  %v324_v49 = vmul.f32 %v1730_v14, %v1679_v39 }
  0x96   : > { %376 = vrot.lane.b32.xlu2 %v368_v51, %s1544_s26 }
  0x97   : > { %v327_v52 = vadd.f32 %v324_v49, %v308_v43 }
  0x9b   : > { %v427_v4 = vpop.permute.xlu0 %426 }
  0x9c   : > { %v432_v7 = vmul.f32 %v427_v4, %v1722_v6  ;;  %v434_v16 = vmul.f32 %v427_v4, %v1730_v14  ;;  %v433_v20 = vmul.f32 %v427_v4, %v1733_v15  ;;  %v435_v26 = vmul.f32 %v1740_v22, %v427_v4 }
  0x9d   : > { %546 = vperm.xlu0 %1498, %v1618_v0   ;;  %408 = vrot.lane.b32.xlu1 %v400_v56, %s1544_s26 }
  0x9e   : > { %382 = vrot.lane.b32.xlu2 %v371_v59, %s1544_s26 }
  0xa4   : > { %v459_v13 = vpop.permute.xlu0 %458 }
  0xa5   : > { %412 = vrot.lane.b32.xlu1 %v402_v62, %s1544_s26  ;;  %1499 = vset.pattern.permute.xlu0 %v1546_v3  ;;  %v461_v24 = vmul.f32 %v459_v13, %v1652_v19  ;;  %v463_v27 = vmul.f32 %v459_v13, %v1661_v25  ;;  %v462_v29 = vmul.f32 %v459_v13, %v1650_v18  ;;  %v1553_v62 = vmov 18  }
  0xa6   : > { %575 = vperm.xlu0 %1499, %v1618_v0   ;;  %410 = vrot.lane.b32.xlu2 %v401_v63, %s1544_s26  ;;  %v464_v36 = vmul.f32 %v459_v13, %v1648_v17  ;;  %v304_v3 = vmul.f32 %v1711_v61, %v1665_v28 }
  0xad   : > { %440 = vrot.lane.b32.xlu1 %v432_v7, %s1544_s26  ;;  %v489_v30 = vpop.permute.xlu0 %488  ;;  %v306_v7 = vadd.f32 %v303_v2, %v1684_v44 }
  0xae   : > { %414 = vrot.lane.b32.xlu2 %v403_v8, %s1544_s26  ;;  %1500 = vset.pattern.permute.xlu0 %v1547_v11  ;;  %v491_v31 = vmul.f32 %v489_v30, %v1670_v33  ;;  %v493_v38 = vmul.f32 %v489_v30, %v1674_v35  ;;  %v492_v41 = vmul.f32 %v489_v30, %v1672_v34 }
  0xaf   : > { %605 = vperm.xlu0 %1500, %v1618_v0   ;;  %v494_v51 = vmul.f32 %v489_v30, %v1700_v55  ;;  %v307_v8 = vadd.f32 %v304_v3, %v1686_v45  ;;  %v323_v11 = vmul.f32 %v1733_v15, %v1679_v39  ;;  %v325_v21 = vadd.f32 %v322_v10, %v306_v7 }
  0xb0   : > { %v1559_v3 = vmov 23  }
  0xb1   : > { %v326_v13 = vadd.f32 %v323_v11, %v307_v8 }
  0xb5   : > { %444 = vrot.lane.b32.xlu1 %v434_v16, %s1544_s26 }
  0xb6   : > { %442 = vrot.lane.b32.xlu2 %v433_v20, %s1544_s26  ;;  %v518_v40 = vpop.permute.xlu0 %517 }
  0xb7   : > { %1501 = vset.pattern.permute.xlu0 %v1548_v23  ;;  %v520_v47 = vmul.f32 %v518_v40, %v1698_v54  ;;  %v522_v57 = vmul.f32 %v518_v40, %v1709_v60  ;;  %v521_v58 = vmul.f32 %v518_v40, %v1711_v61  ;;  %v523_v59 = vmul.f32 %v518_v40, %v1720_v5 }
  0xb8   : > { %634 = vperm.xlu0 %1501, %v1618_v0  }
  0xbd   : > { %469 = vrot.lane.b32.xlu1 %v461_v24, %s1549_s27 }
  0xbe   : > { %446 = vrot.lane.b32.xlu2 %v435_v26, %s1544_s26 }
  0xc0   : > { %1502 = vset.pattern.permute.xlu0 %v1550_v12 }
  0xc1   : > { %663 = vperm.xlu0 %1502, %v1618_v0  }
  0xc5   : > { %473 = vrot.lane.b32.xlu1 %v463_v27, %s1549_s27  ;;  %v344_v37 = vpop.permute.xlu2 %343 }
  0xc6   : > { %471 = vrot.lane.b32.xlu2 %v462_v29, %s1549_s27  ;;  %v1555_v29 = vmov 20  }
  0xc9   : > { %1503 = vset.pattern.permute.xlu0 %v1551_v32 }
  0xca   : > { %692 = vperm.xlu0 %1503, %v1618_v0  }
  0xcd   : > { %499 = vrot.lane.b32.xlu1 %v491_v31, %s1549_s27  ;;  %v348_v50 = vpop.permute.xlu2 %347 }
  0xce   : > { %475 = vrot.lane.b32.xlu2 %v464_v36, %s1549_s27 }
  0xd2   : > { %1504 = vset.pattern.permute.xlu0 %v1552_v48 }
  0xd3   : > { %722 = vperm.xlu0 %1504, %v1618_v0  }
  0xd5   : > { %503 = vrot.lane.b32.xlu1 %v493_v38, %s1549_s27 }
  0xd6   : > { %501 = vrot.lane.b32.xlu2 %v492_v41, %s1549_s27  ;;  %v1556_v41 = vmov 21  }
  0xdb   : > { %1505 = vset.pattern.permute.xlu0 %v1553_v62 }
  0xdc   : > { %v350_v53 = vpop.permute.xlu0 %349  ;;  %751 = vperm.xlu0 %1505, %v1618_v0   ;;  %v346_v4 = vpop.permute.xlu1 %345 }
  0xdd   : > { %528 = vrot.lane.b32.xlu1 %v520_v47, %s1549_s27  ;;  %v354_v56 = vsel %vm351_vm0, %v348_v50, %v350_v53  ;;  %v352_v16 = vsel %vm351_vm0, %v344_v37, %v346_v4  ;;  %v353_v20 = vsel %vm351_vm0, %v346_v4, %v348_v50  ;;  %v1558_v53 = vmov 22  }
  0xde   : > { %v1771_v46 = vadd.f32 %v354_v56, %v327_v52  ;;  %505 = vrot.lane.b32.xlu2 %v494_v51, %s1549_s27  ;;  %v358_v28 = vadd.f32 %v352_v16, %v325_v21  ;;  %v359_v23 = vadd.f32 %v353_v20, %v326_v13 }
  0xe4   : > { %1506 = vset.pattern.permute.xlu0 %v1554_v1 }
  0xe5   : > { %532 = vrot.lane.b32.xlu1 %v522_v57, %s1549_s27  ;;  %780 = vperm.xlu0 %1506, %v1618_v0  }
  0xe6   : > { %530 = vrot.lane.b32.xlu2 %v521_v58, %s1549_s27 }
  0xed   : > { %1507 = vset.pattern.permute.xlu0 %v1555_v29 }
  0xee   : > { %534 = vrot.lane.b32.xlu2 %v523_v59, %s1549_s27  ;;  %809 = vperm.xlu0 %1507, %v1618_v0  }
  0xf0   : > { %v377_v63 = vpop.permute.xlu2 %376 }
  0xf6   : > { %1508 = vset.pattern.permute.xlu0 %v1556_v41 }
  0xf7   : > { %839 = vperm.xlu0 %1508, %v1618_v0  }
  0xf8   : > { %v1788_v9 = vpop.permute.xlu2 %382 }
  0xff   : > { %1509 = vset.pattern.permute.xlu0 %v1558_v53  ;;  %v1563_v53 = vmov 26  }
 0x100   : > { %v1805_v39 = vpop.permute.xlu2 %410  ;;  %868 = vperm.xlu0 %1509, %v1618_v0  }
 0x107   : > { %v379_v24 = vpop.permute.xlu0 %378  ;;  %v1796_v44 = vpop.permute.xlu1 %380 }
 0x108   : > { %v384_v45 = vsel %vm351_vm0, %v377_v63, %v379_v24  ;;  %v385_v26 = vsel %vm351_vm0, %v379_v24, %v1796_v44  ;;  %v1812_v36 = vpop.permute.xlu2 %414  ;;  %1510 = vset.pattern.permute.xlu0 %v1559_v3 }
 0x109   : > { %v1801_v12 = vadd.f32 %v384_v45, %v358_v28  ;;  %v1803_v27 = vadd.f32 %v385_v26, %v359_v23  ;;  %897 = vperm.xlu0 %1510, %v1618_v0   ;;  %v1560_v28 = vmov 24  }
 0x10f   : > { %v547_v30 = vpop.permute.xlu0 %546  ;;  %v1823_v48 = vpop.permute.xlu1 %408 }
 0x110   : > { %v549_v31 = vmul.f32 %v547_v30, %v1722_v6  ;;  %v550_v32 = vmul.f32 %v547_v30, %v1733_v15  ;;  %v551_v37 = vmul.f32 %v547_v30, %v1730_v14  ;;  %v552_v38 = vmul.f32 %v547_v30, %v1740_v22  ;;  %v1819_v42 = vpop.permute.xlu2 %442 }
 0x111   : > { %1511 = vset.pattern.permute.xlu0 %v1560_v28 }
 0x112   : > { %557 = vrot.lane.b32.xlu1 %v549_v31, %s1549_s27  ;;  %559 = vrot.lane.b32.xlu2 %v550_v32, %s1549_s27 }
 0x113   : > { %926 = vperm.xlu0 %1511, %v1618_v0  }
 0x117   : > { %v1833_v56 = vpop.permute.xlu1 %412 }
 0x118   : > { %v576_v40 = vpop.permute.xlu0 %575  ;;  %v1827_v49 = vpop.permute.xlu2 %446 }
 0x119   : > { %v578_v43 = vmul.f32 %v576_v40, %v1652_v19  ;;  %v579_v47 = vmul.f32 %v576_v40, %v1650_v18  ;;  %v580_v50 = vmul.f32 %v576_v40, %v1661_v25  ;;  %v581_v51 = vmul.f32 %v576_v40, %v1648_v17 }
 0x11a   : > { %561 = vrot.lane.b32.xlu1 %v551_v37, %s1549_s27  ;;  %563 = vrot.lane.b32.xlu2 %v552_v38, %s1549_s27  ;;  %v1561_v37 = vmov 25  }
 0x11b   : > { %1512 = vset.pattern.permute.xlu0 %v1561_v37 }
 0x11c   : > { %956 = vperm.xlu0 %1512, %v1618_v0  }
 0x11f   : > { %v1842_v62 = vpop.permute.xlu1 %440 }
 0x120   : > { %v1838_v59 = vpop.permute.xlu2 %471 }
 0x121   : > { %v606_v52 = vpop.permute.xlu0 %605 }
 0x122   : > { %586 = vrot.lane.b32.xlu1 %v578_v43, %s1557_s28  ;;  %588 = vrot.lane.b32.xlu2 %v579_v47, %s1557_s28  ;;  %v608_v57 = vmul.f32 %v606_v52, %v1670_v33  ;;  %v609_v58 = vmul.f32 %v606_v52, %v1672_v34  ;;  %v610_v63 = vmul.f32 %v606_v52, %v1674_v35 }
 0x123   : > { %v611_v1 = vmul.f32 %v606_v52, %v1700_v55 }
 0x124   : > { %1513 = vset.pattern.permute.xlu0 %v1563_v53 }
 0x125   : > { %985 = vperm.xlu0 %1513, %v1618_v0  }
 0x127   : > { %v1853_v10 = vpop.permute.xlu1 %444 }
 0x128   : > { %v1848_v4 = vpop.permute.xlu2 %475 }
 0x12a   : > { %590 = vrot.lane.b32.xlu1 %v580_v50, %s1557_s28  ;;  %592 = vrot.lane.b32.xlu2 %v581_v51, %s1557_s28  ;;  %v635_v2 = vpop.permute.xlu0 %634 }
 0x12b   : > { %v637_v7 = vmul.f32 %v635_v2, %v1698_v54  ;;  %v638_v8 = vmul.f32 %v635_v2, %v1711_v61  ;;  %v639_v16 = vmul.f32 %v635_v2, %v1709_v60  ;;  %v640_v20 = vmul.f32 %v635_v2, %v1720_v5 }
 0x12f   : > { %v470_v21 = vpop.permute.xlu1 %469 }
 0x130   : > { %v1857_v11 = vpop.permute.xlu2 %501 }
 0x132   : > { %616 = vrot.lane.b32.xlu1 %v608_v57, %s1557_s28  ;;  %618 = vrot.lane.b32.xlu2 %v609_v58, %s1557_s28 }
 0x133   : > { %v664_v13 = vpop.permute.xlu0 %663 }
 0x134   : > { %v666_v23 = vmul.f32 %v664_v13, %v1722_v6  ;;  %v667_v24 = vmul.f32 %v664_v13, %v1733_v15  ;;  %v668_v29 = vmul.f32 %v664_v13, %v1730_v14  ;;  %v669_v30 = vmul.f32 %v664_v13, %v1740_v22 }
 0x135   : > { %v1564_v13 = vmov 27  }
 0x136   : > { %1514 = vset.pattern.permute.xlu0 %v1564_v13 }
 0x137   : > { %v1870_v26 = vpop.permute.xlu1 %473  ;;  %1014 = vperm.xlu0 %1514, %v1618_v0  }
 0x138   : > { %v1866_v45 = vpop.permute.xlu2 %505  ;;  %v480_v53 = vsel %vm477_vm1, %v1870_v26, %v1848_v4 }
 0x13a   : > { %620 = vrot.lane.b32.xlu1 %v610_v63, %s1557_s28  ;;  %622 = vrot.lane.b32.xlu2 %v611_v1, %s1557_s28 }
 0x13c   : > { %v693_v32 = vpop.permute.xlu0 %692 }
 0x13d   : > { %v695_v40 = vmul.f32 %v693_v32, %v1652_v19  ;;  %v696_v41 = vmul.f32 %v693_v32, %v1650_v18  ;;  %v697_v50 = vmul.f32 %v693_v32, %v1661_v25  ;;  %v698_v51 = vmul.f32 %v693_v32, %v1648_v17 }
 0x13f   : > { %v500_v38 = vpop.permute.xlu1 %499 }
 0x140   : > { %v1874_v31 = vpop.permute.xlu2 %530 }
 0x142   : > { %645 = vrot.lane.b32.xlu1 %v637_v7, %s1557_s28  ;;  %647 = vrot.lane.b32.xlu2 %v638_v8, %s1557_s28  ;;  %v416_v8 = vsel %vm351_vm0, %v1823_v48, %v1805_v39  ;;  %v478_v48 = vsel %vm477_vm1, %v470_v21, %v1838_v59  ;;  %v418_v21 = vsel %vm351_vm0, %v1833_v56, %v1812_v36 }
 0x143   : > { %v422_v28 = vadd.f32 %v416_v8, %v1801_v12  ;;  %v507_v12 = vsel %vm477_vm1, %v500_v38, %v1857_v11 }
 0x145   : > { %v723_v52 = vpop.permute.xlu0 %722 }
 0x146   : > { %v725_v58 = vmul.f32 %v723_v52, %v1670_v33  ;;  %v726_v63 = vmul.f32 %v723_v52, %v1672_v34  ;;  %v727_v3 = vmul.f32 %v723_v52, %v1674_v35  ;;  %v728_v7 = vmul.f32 %v723_v52, %v1700_v55 }
 0x147   : > { %v504_v47 = vpop.permute.xlu1 %503 }
 0x148   : > { %v1883_v43 = vpop.permute.xlu2 %534 }
 0x14a   : > { %649 = vrot.lane.b32.xlu1 %v639_v16, %s1557_s28  ;;  %651 = vrot.lane.b32.xlu2 %v640_v20, %s1557_s28  ;;  %v448_v16 = vsel %vm351_vm0, %v1842_v62, %v1819_v42  ;;  %v386_v62 = vsel %vm351_vm0, %v1796_v44, %v1788_v9  ;;  %v449_v9 = vsel %vm351_vm0, %v1819_v42, %v1853_v10 }
 0x14b   : > { %v450_v44 = vsel %vm351_vm0, %v1853_v10, %v1827_v49  ;;  %v509_v10 = vsel %vm477_vm1, %v504_v47, %v1866_v45  ;;  %v1565_v45 = vmov 28  }
 0x14c   : > { %1515 = vset.pattern.permute.xlu0 %v1565_v45 }
 0x14d   : > { %1043 = vperm.xlu0 %1515, %v1618_v0  }
 0x14e   : > { %v752_v20 = vpop.permute.xlu0 %751 }
 0x14f   : > { %v529_v1 = vpop.permute.xlu1 %528  ;;  %v755_v32 = vmul.f32 %v752_v20, %v1711_v61 }
 0x152   : > { %674 = vrot.lane.b32.xlu1 %v666_v23, %s1557_s28  ;;  %676 = vrot.lane.b32.xlu2 %v667_v24, %s1557_s28 }
 0x157   : > { %v533_v23 = vpop.permute.xlu1 %532 }
 0x158   : > { %v537_v4 = vsel %vm477_vm1, %v1874_v31, %v533_v23 }
 0x15a   : > { %678 = vrot.lane.b32.xlu1 %v668_v29, %s1557_s28  ;;  %680 = vrot.lane.b32.xlu2 %v669_v30, %s1557_s28  ;;  %v454_v29 = vadd.f32 %v448_v16, %v422_v28  ;;  %v754_v30 = vmul.f32 %v752_v20, %v1698_v54 }
 0x15c   : > { %v484_v37 = vadd.f32 %v478_v48, %v454_v29 }
 0x162   : > { %703 = vrot.lane.b32.xlu1 %v695_v40, %s1562_s29  ;;  %705 = vrot.lane.b32.xlu2 %v696_v41, %s1562_s29  ;;  %v417_v40 = vsel %vm351_vm0, %v1805_v39, %v1833_v56  ;;  %v536_v41 = vsel %vm477_vm1, %v529_v1, %v1874_v31 }
 0x163   : > { %v423_v39 = vadd.f32 %v417_v40, %v1803_v27  ;;  %v508_v27 = vsel %vm477_vm1, %v1857_v11, %v504_v47  ;;  %v781_v11 = vpop.permute.xlu0 %780 }
 0x164   : > { %v783_v29 = vmul.f32 %v781_v11, %v1722_v6 }
 0x16a   : > { %707 = vrot.lane.b32.xlu1 %v697_v50, %s1562_s29  ;;  %709 = vrot.lane.b32.xlu2 %v698_v51, %s1562_s29  ;;  %v392_v50 = vadd.f32 %v386_v62, %v1771_v46  ;;  %v513_v51 = vadd.f32 %v507_v12, %v484_v37  ;;  %v479_v46 = vsel %vm477_vm1, %v1838_v59, %v1870_v26 }
 0x16b   : > { %v756_v59 = vmul.f32 %v752_v20, %v1709_v60  ;;  %v538_v26 = vsel %vm477_vm1, %v533_v23, %v1883_v43  ;;  %v785_v37 = vmul.f32 %v781_v11, %v1730_v14  ;;  %v810_v40 = vpop.permute.xlu0 %809 }
 0x16c   : > { %v1889_v57 = vpop.permute.xlu2 %559  ;;  %v424_v36 = vadd.f32 %v418_v21, %v392_v50  ;;  %v542_v56 = vadd.f32 %v536_v41, %v513_v51 }
 0x172   : > { %733 = vrot.lane.b32.xlu1 %v725_v58, %s1562_s29  ;;  %735 = vrot.lane.b32.xlu2 %v726_v63, %s1562_s29  ;;  %v455_v58 = vadd.f32 %v449_v9, %v423_v39  ;;  %v456_v63 = vadd.f32 %v450_v44, %v424_v36  ;;  %v812_v39 = vmul.f32 %v810_v40, %v1652_v19 }
 0x173   : > { %v813_v36 = vmul.f32 %v810_v40, %v1650_v18 }
 0x174   : > { %v1896_v2 = vpop.permute.xlu2 %563  ;;  %v485_v1 = vadd.f32 %v479_v46, %v455_v58  ;;  %v840_v58 = vpop.permute.xlu0 %839 }
 0x176   : > { %v514_v8 = vadd.f32 %v508_v27, %v485_v1 }
 0x178   : > { %v543_v47 = vadd.f32 %v537_v4, %v514_v8 }
 0x17a   : > { %737 = vrot.lane.b32.xlu1 %v727_v3, %s1562_s29  ;;  %739 = vrot.lane.b32.xlu2 %v728_v7, %s1562_s29  ;;  %v486_v3 = vadd.f32 %v480_v53, %v456_v63  ;;  %v757_v7 = vmul.f32 %v752_v20, %v1720_v5  ;;  %v814_v53 = vmul.f32 %v810_v40, %v1661_v25 }
 0x17c   : > { %v1909_v24 = vpop.permute.xlu2 %588  ;;  %v515_v16 = vadd.f32 %v509_v10, %v486_v3  ;;  %v842_v3 = vmul.f32 %v840_v58, %v1670_v33  ;;  %v869_v45 = vpop.permute.xlu0 %868 }
 0x17e   : > { %v544_v13 = vadd.f32 %v538_v26, %v515_v16  ;;  %v844_v16 = vmul.f32 %v840_v58, %v1674_v35 }
 0x182   : > { %762 = vrot.lane.b32.xlu1 %v754_v30, %s1562_s29  ;;  %764 = vrot.lane.b32.xlu2 %v755_v32, %s1562_s29  ;;  %v784_v30 = vmul.f32 %v781_v11, %v1733_v15 }
 0x184   : > { %v558_v38 = vpop.permute.xlu1 %557  ;;  %v593_v52 = vpop.permute.xlu2 %592 }
 0x185   : > { %v565_v42 = vsel %vm477_vm1, %v558_v38, %v1889_v57 }
 0x186   : > { %v571_v49 = vadd.f32 %v565_v42, %v542_v56  ;;  %v1566_v56 = vmov 29   ;;  %v815_v42 = vmul.f32 %v810_v40, %v1648_v17 }
 0x187   : > { %1516 = vset.pattern.permute.xlu0 %v1566_v56 }
 0x188   : > { %1073 = vperm.xlu0 %1516, %v1618_v0  }
 0x18a   : > { %766 = vrot.lane.b32.xlu1 %v756_v59, %s1562_s29  ;;  %768 = vrot.lane.b32.xlu2 %v757_v7, %s1562_s29  ;;  %v843_v59 = vmul.f32 %v840_v58, %v1672_v34 }
 0x18c   : > { %v562_v28 = vpop.permute.xlu1 %561  ;;  %v619_v48 = vpop.permute.xlu2 %618 }
 0x18d   : > { %v566_v31 = vsel %vm477_vm1, %v1889_v57, %v562_v28  ;;  %v567_v43 = vsel %vm477_vm1, %v562_v28, %v1896_v2  ;;  %v786_v2 = vmul.f32 %v781_v11, %v1740_v22  ;;  %v845_v11 = vmul.f32 %v840_v58, %v1700_v55 }
 0x18e   : > { %v572_v20 = vadd.f32 %v566_v31, %v543_v47  ;;  %v573_v23 = vadd.f32 %v567_v43, %v544_v13 }
 0x192   : > { %791 = vrot.lane.b32.xlu1 %v783_v29, %s1562_s29  ;;  %793 = vrot.lane.b32.xlu2 %v784_v30, %s1562_s29 }
 0x194   : > { %v587_v32 = vpop.permute.xlu1 %586  ;;  %v623_v62 = vpop.permute.xlu2 %622 }
 0x195   : > { %v595_v12 = vsel %vm594_vm2, %v587_v32, %v1909_v24 }
 0x196   : > { %v601_v57 = vadd.f32 %v595_v12, %v571_v49  ;;  %v873_v12 = vmul.f32 %v869_v45, %v1709_v60 }
 0x19a   : > { %795 = vrot.lane.b32.xlu1 %v785_v37, %s1562_s29  ;;  %797 = vrot.lane.b32.xlu2 %v786_v2, %s1562_s29  ;;  %v898_v37 = vpop.permute.xlu0 %897 }
 0x19c   : > { %v591_v21 = vpop.permute.xlu1 %590  ;;  %v648_v41 = vpop.permute.xlu2 %647 }
 0x19d   : > { %v596_v50 = vsel %vm594_vm2, %v1909_v24, %v591_v21  ;;  %v597_v51 = vsel %vm594_vm2, %v591_v21, %v593_v52 }
 0x19e   : > { %v602_v9 = vadd.f32 %v596_v50, %v572_v20  ;;  %v603_v44 = vadd.f32 %v597_v51, %v573_v23  ;;  %v871_v20 = vmul.f32 %v869_v45, %v1698_v54  ;;  %v872_v23 = vmul.f32 %v869_v45, %v1711_v61 }
 0x1a2   : > { %820 = vrot.lane.b32.xlu1 %v812_v39, %s1567_s30  ;;  %822 = vrot.lane.b32.xlu2 %v813_v36, %s1567_s30 }
 0x1a4   : > { %v617_v38 = vpop.permute.xlu1 %616  ;;  %v652_v46 = vpop.permute.xlu2 %651 }
 0x1a5   : > { %v624_v24 = vsel %vm594_vm2, %v617_v38, %v619_v48 }
 0x1a6   : > { %v630_v52 = vadd.f32 %v624_v24, %v601_v57  ;;  %v874_v57 = vmul.f32 %v869_v45, %v1720_v5  ;;  %v903_v24 = vmul.f32 %v898_v37, %v1740_v22 }
 0x1aa   : > { %824 = vrot.lane.b32.xlu1 %v814_v53, %s1567_s30  ;;  %826 = vrot.lane.b32.xlu2 %v815_v42, %s1567_s30 }
 0x1ac   : > { %v621_v0 = vpop.permute.xlu1 %620  ;;  %v677_v63 = vpop.permute.xlu2 %676 }
 0x1ad   : > { %v625_v49 = vsel %vm594_vm2, %v619_v48, %v621_v0  ;;  %v626_v27 = vsel %vm594_vm2, %v621_v0, %v623_v62 }
 0x1ae   : > { %v631_v10 = vadd.f32 %v625_v49, %v602_v9  ;;  %v632_v1 = vadd.f32 %v626_v27, %v603_v44  ;;  %v900_v9 = vmul.f32 %v898_v37, %v1722_v6  ;;  %v901_v44 = vmul.f32 %v898_v37, %v1733_v15 }
 0x1b2   : > { %850 = vrot.lane.b32.xlu1 %v842_v3, %s1567_s30  ;;  %852 = vrot.lane.b32.xlu2 %v843_v59, %s1567_s30 }
 0x1b4   : > { %v646_v7 = vpop.permute.xlu1 %645  ;;  %v681_v4 = vpop.permute.xlu2 %680 }
 0x1b5   : > { %v653_v26 = vsel %vm594_vm2, %v646_v7, %v648_v41 }
 0x1b6   : > { %v659_v8 = vadd.f32 %v653_v26, %v630_v52  ;;  %v927_v52 = vpop.permute.xlu0 %926 }
 0x1b7   : > { %v929_v27 = vmul.f32 %v927_v52, %v1652_v19  ;;  %v932_v26 = vmul.f32 %v927_v52, %v1648_v17 }
 0x1ba   : > { %854 = vrot.lane.b32.xlu1 %v844_v16, %s1567_s30  ;;  %856 = vrot.lane.b32.xlu2 %v845_v11, %s1567_s30 }
 0x1bc   : > { %v650_v47 = vpop.permute.xlu1 %649  ;;  %v706_v13 = vpop.permute.xlu2 %705 }
 0x1bd   : > { %v654_v28 = vsel %vm594_vm2, %v648_v41, %v650_v47  ;;  %v655_v48 = vsel %vm594_vm2, %v650_v47, %v652_v46  ;;  %v902_v46 = vmul.f32 %v898_v37, %v1730_v14 }
 0x1be   : > { %v660_v31 = vadd.f32 %v654_v28, %v631_v10  ;;  %v661_v43 = vadd.f32 %v655_v48, %v632_v1  ;;  %v930_v10 = vmul.f32 %v927_v52, %v1650_v18 }
 0x1c2   : > { %879 = vrot.lane.b32.xlu1 %v871_v20, %s1567_s30  ;;  %881 = vrot.lane.b32.xlu2 %v872_v23, %s1567_s30 }
 0x1c4   : > { %v675_v29 = vpop.permute.xlu1 %674  ;;  %v710_v30 = vpop.permute.xlu2 %709 }
 0x1c5   : > { %v682_v32 = vsel %vm594_vm2, %v675_v29, %v677_v63 }
 0x1c6   : > { %v688_v62 = vadd.f32 %v682_v32, %v659_v8  ;;  %v957_v8 = vpop.permute.xlu0 %956 }
 0x1c7   : > { %v959_v48 = vmul.f32 %v957_v8, %v1670_v33  ;;  %v962_v32 = vmul.f32 %v957_v8, %v1700_v55 }
 0x1ca   : > { %883 = vrot.lane.b32.xlu1 %v873_v12, %s1567_s30  ;;  %885 = vrot.lane.b32.xlu2 %v874_v57, %s1567_s30 }
 0x1cc   : > { %v679_v2 = vpop.permute.xlu1 %678  ;;  %v736_v40 = vpop.permute.xlu2 %735 }
 0x1cd   : > { %v683_v21 = vsel %vm594_vm2, %v677_v63, %v679_v2  ;;  %v684_v41 = vsel %vm594_vm2, %v679_v2, %v681_v4  ;;  %v931_v4 = vmul.f32 %v927_v52, %v1661_v25 }
 0x1ce   : > { %v689_v50 = vadd.f32 %v683_v21, %v660_v31  ;;  %v690_v51 = vadd.f32 %v684_v41, %v661_v43  ;;  %v960_v31 = vmul.f32 %v957_v8, %v1672_v34 }
 0x1d2   : > { %908 = vrot.lane.b32.xlu1 %v900_v9, %s1567_s30  ;;  %910 = vrot.lane.b32.xlu2 %v901_v44, %s1567_s30 }
 0x1d4   : > { %v704_v39 = vpop.permute.xlu1 %703  ;;  %v740_v36 = vpop.permute.xlu2 %739 }
 0x1d5   : > { %v712_v56 = vsel %vm711_vm3, %v704_v39, %v706_v13 }
 0x1d6   : > { %v718_v38 = vadd.f32 %v712_v56, %v688_v62  ;;  %v986_v62 = vpop.permute.xlu0 %985  ;;  %v1569_v56 = vmov 34  }
 0x1d7   : > { %v988_v41 = vmul.f32 %v986_v62, %v1698_v54  ;;  %1521 = vset.pattern.permute.xlu0 %v1569_v56  ;;  %v1574_v56 = vmov 32  }
 0x1da   : > { %912 = vrot.lane.b32.xlu1 %v902_v46, %s1567_s30  ;;  %914 = vrot.lane.b32.xlu2 %v903_v24, %s1567_s30  ;;  %v991_v46 = vmul.f32 %v986_v62, %v1720_v5  ;;  %v2054_v24 = vld [vmem:[%s2219_s1] sm:$0xff] }
 0x1db   : > { %1219 = vperm.xlu0 %1521, %v2054_v24  }
 0x1dc   : > { %v708_v53 = vpop.permute.xlu1 %707  ;;  %v765_v42 = vpop.permute.xlu2 %764 }
 0x1dd   : > { %v713_v58 = vsel %vm711_vm3, %v706_v13, %v708_v53  ;;  %v714_v0 = vsel %vm711_vm3, %v708_v53, %v710_v30  ;;  %v961_v30 = vmul.f32 %v957_v8, %v1674_v35 }
 0x1de   : > { %v719_v63 = vadd.f32 %v713_v58, %v689_v50  ;;  %v720_v49 = vadd.f32 %v714_v0, %v690_v51  ;;  %v989_v50 = vmul.f32 %v986_v62, %v1711_v61  ;;  %v1015_v51 = vpop.permute.xlu0 %1014 }
 0x1e2   : > { %937 = vrot.lane.b32.xlu1 %v929_v27, %s1568_s6  ;;  %939 = vrot.lane.b32.xlu2 %v930_v10, %s1568_s6 }
 0x1e4   : > { %v734_v1 = vpop.permute.xlu1 %733  ;;  %v769_v3 = vpop.permute.xlu2 %768 }
 0x1e5   : > { %v741_v59 = vsel %vm711_vm3, %v734_v1, %v736_v40  ;;  %v1570_v1 = vmov 31  }
 0x1e6   : > { %v747_v7 = vadd.f32 %v741_v59, %v718_v38  ;;  %v990_v38 = vmul.f32 %v986_v62, %v1709_v60  ;;  %v1044_v52 = vpop.permute.xlu0 %1043  ;;  %1518 = vset.pattern.permute.xlu2 %v1570_v1 }
 0x1ea   : > { %941 = vrot.lane.b32.xlu1 %v931_v4, %s1568_s6  ;;  %943 = vrot.lane.b32.xlu2 %v932_v26, %s1568_s6 }
 0x1ec   : > { %v738_v16 = vpop.permute.xlu1 %737  ;;  %v794_v11 = vpop.permute.xlu2 %793 }
 0x1ed   : > { %v742_v45 = vsel %vm711_vm3, %v736_v40, %v738_v16  ;;  %v743_v47 = vsel %vm711_vm3, %v738_v16, %v740_v36 }
 0x1ee   : > { %v748_v13 = vadd.f32 %v742_v45, %v719_v63  ;;  %v749_v28 = vadd.f32 %v743_v47, %v720_v49  ;;  %v1017_v63 = vmul.f32 %v1015_v51, %v1722_v6  ;;  %v1018_v49 = vmul.f32 %v1015_v51, %v1733_v15 }
 0x1ef   : > { %v1020_v45 = vmul.f32 %v1015_v51, %v1740_v22 }
 0x1f2   : > { %967 = vrot.lane.b32.xlu1 %v959_v48, %s1568_s6  ;;  %969 = vrot.lane.b32.xlu2 %v960_v31, %s1568_s6  ;;  %v1046_v31 = vmul.f32 %v1044_v52, %v1652_v19 }
 0x1f4   : > { %v763_v43 = vpop.permute.xlu1 %762  ;;  %v798_v20 = vpop.permute.xlu2 %797 }
 0x1f5   : > { %v770_v23 = vsel %vm711_vm3, %v763_v43, %v765_v42 }
 0x1f6   : > { %v776_v29 = vadd.f32 %v770_v23, %v747_v7  ;;  %v1047_v23 = vmul.f32 %v1044_v52, %v1650_v18 }
 0x1fa   : > { %971 = vrot.lane.b32.xlu1 %v961_v30, %s1568_s6  ;;  %973 = vrot.lane.b32.xlu2 %v962_v32, %s1568_s6  ;;  %v2063_v59 = vpop.permute.xlu0 %1073 }
 0x1fb   : > { %v1079_v7 = vmul.f32 %v2063_v59, %v1700_v55  ;;  %v1078_v1 = vmul.f32 %v2063_v59, %v1674_v35 }
 0x1fc   : > { %v767_v12 = vpop.permute.xlu1 %766  ;;  %v823_v57 = vpop.permute.xlu2 %822 }
 0x1fd   : > { %v771_v37 = vsel %vm711_vm3, %v765_v42, %v767_v12  ;;  %v772_v2 = vsel %vm711_vm3, %v767_v12, %v769_v3  ;;  %v1571_v3 = vmov 30   ;;  %1090 = vrot.lane.b32.xlu0 %v1079_v7, %s1572_s9 }
 0x1fe   : > { %v777_v40 = vadd.f32 %v771_v37, %v748_v13  ;;  %v778_v21 = vadd.f32 %v772_v2, %v749_v28  ;;  %1517 = vset.pattern.permute.xlu1 %v1571_v3  ;;  %v1049_v37 = vmul.f32 %v1044_v52, %v1648_v17  ;;  %v1077_v3 = vmul.f32 %v2063_v59, %v1672_v34 }
 0x202   : > { %996 = vrot.lane.b32.xlu1 %v988_v41, %s1568_s6  ;;  %998 = vrot.lane.b32.xlu2 %v989_v50, %s1568_s6 }
 0x204   : > { %v792_v9 = vpop.permute.xlu1 %791  ;;  %v827_v44 = vpop.permute.xlu2 %826 }
 0x205   : > { %v799_v39 = vsel %vm711_vm3, %v792_v9, %v794_v11 }
 0x206   : > { %v805_v36 = vadd.f32 %v799_v39, %v776_v29  ;;  %v1573_v29 = vmov 35  }
 0x207   : > { %1523 = vset.pattern.permute.xlu0 %v1573_v29 }
 0x20a   : > { %1000 = vrot.lane.b32.xlu1 %v990_v38, %s1568_s6  ;;  %1002 = vrot.lane.b32.xlu2 %v991_v46, %s1568_s6  ;;  %v1575_v38 = vmov 33  }
 0x20c   : > { %v796_v53 = vpop.permute.xlu1 %795  ;;  %v853_v42 = vpop.permute.xlu2 %852 }
 0x20d   : > { %v800_v58 = vsel %vm711_vm3, %v794_v11, %v796_v53  ;;  %v801_v0 = vsel %vm711_vm3, %v796_v53, %v798_v20  ;;  %v1019_v11 = vmul.f32 %v1015_v51, %v1730_v14 }
 0x20e   : > { %v806_v27 = vadd.f32 %v800_v58, %v777_v40  ;;  %v807_v10 = vadd.f32 %v801_v0, %v778_v21  ;;  %v1076_v0 = vmul.f32 %v2063_v59, %v1670_v33 }
 0x212   : > { %1025 = vrot.lane.b32.xlu1 %v1017_v63, %s1568_s6  ;;  %1027 = vrot.lane.b32.xlu2 %v1018_v49, %s1568_s6 }
 0x214   : > { %v821_v4 = vpop.permute.xlu1 %820  ;;  %v857_v26 = vpop.permute.xlu2 %856 }
 0x215   : > { %v829_v8 = vsel %vm828_vm4, %v821_v4, %v823_v57 }
 0x216   : > { %v835_v16 = vadd.f32 %v829_v8, %v805_v36 }
 0x21a   : > { %1029 = vrot.lane.b32.xlu1 %v1019_v11, %s1568_s6  ;;  %1031 = vrot.lane.b32.xlu2 %v1020_v45, %s1568_s6 }
 0x21c   : > { %v825_v47 = vpop.permute.xlu1 %824  ;;  %v882_v13 = vpop.permute.xlu2 %881 }
 0x21d   : > { %v830_v28 = vsel %vm828_vm4, %v823_v57, %v825_v47  ;;  %v831_v48 = vsel %vm828_vm4, %v825_v47, %v827_v44  ;;  %v1048_v57 = vmul.f32 %v1044_v52, %v1661_v25 }
 0x21e   : > { %v836_v43 = vadd.f32 %v830_v28, %v806_v27  ;;  %v837_v20 = vadd.f32 %v831_v48, %v807_v10 }
 0x222   : > { %1054 = vrot.lane.b32.xlu1 %v1046_v31, %s1572_s9  ;;  %1056 = vrot.lane.b32.xlu2 %v1047_v23, %s1572_s9 }
 0x224   : > { %v851_v30 = vpop.permute.xlu1 %850  ;;  %v886_v32 = vpop.permute.xlu2 %885 }
 0x225   : > { %v858_v62 = vsel %vm828_vm4, %v851_v30, %v853_v42 }
 0x226   : > { %v864_v12 = vadd.f32 %v858_v62, %v835_v16 }
 0x22a   : > { %1058 = vrot.lane.b32.xlu1 %v1048_v57, %s1572_s9  ;;  %1060 = vrot.lane.b32.xlu2 %v1049_v37, %s1572_s9 }
 0x22c   : > { %v855_v2 = vpop.permute.xlu1 %854  ;;  %v911_v51 = vpop.permute.xlu2 %910 }
 0x22d   : > { %v859_v40 = vsel %vm828_vm4, %v853_v42, %v855_v2  ;;  %v860_v21 = vsel %vm828_vm4, %v855_v2, %v857_v26 }
 0x22e   : > { %v865_v41 = vadd.f32 %v859_v40, %v836_v43  ;;  %v866_v50 = vadd.f32 %v860_v21, %v837_v20 }
 0x232   : > { %1102 = vperm.xlu1 %1517, %v2054_v24   ;;  %1131 = vperm.xlu2 %1518, %v2054_v24  }
 0x234   : > { %v880_v9 = vpop.permute.xlu1 %879  ;;  %v915_v36 = vpop.permute.xlu2 %914 }
 0x235   : > { %v887_v44 = vsel %vm828_vm4, %v880_v9, %v882_v13 }
 0x236   : > { %v893_v39 = vadd.f32 %v887_v44, %v864_v12 }
 0x23a   : > { %1519 = vset.pattern.permute.xlu1 %v1574_v56  ;;  %1520 = vset.pattern.permute.xlu2 %v1575_v38 }
 0x23b   : > { %1160 = vperm.xlu1 %1519, %v2054_v24   ;;  %1190 = vperm.xlu2 %1520, %v2054_v24  }
 0x23c   : > { %v884_v46 = vpop.permute.xlu1 %883  ;;  %v940_v63 = vpop.permute.xlu2 %939 }
 0x23d   : > { %v888_v52 = vsel %vm828_vm4, %v882_v13, %v884_v46  ;;  %v889_v53 = vsel %vm828_vm4, %v884_v46, %v886_v32 }
 0x23e   : > { %v894_v42 = vadd.f32 %v888_v52, %v865_v41  ;;  %v895_v58 = vadd.f32 %v889_v53, %v866_v50 }
 0x243   : > { %1522 = vset.pattern.permute.xlu1 %v1573_v29  ;;  %1084 = vrot.lane.b32.xlu2 %v1076_v0, %s1572_s9 }
 0x244   : > { %1248 = vperm.xlu1 %1522, %v2054_v24   ;;  %v909_v49 = vpop.permute.xlu1 %908  ;;  %v944_v7 = vpop.permute.xlu2 %943 }
 0x245   : > { %v916_v27 = vsel %vm828_vm4, %v909_v49, %v911_v51 }
 0x246   : > { %v922_v10 = vadd.f32 %v916_v27, %v893_v39 }
 0x24b   : > { %1088 = vrot.lane.b32.xlu2 %v1078_v1, %s1572_s9 }
 0x24c   : > { %1086 = vrot.lane.b32.xlu1 %v1077_v3, %s1572_s9  ;;  %v913_v4 = vpop.permute.xlu1 %912  ;;  %v970_v47 = vpop.permute.xlu2 %969 }
 0x24d   : > { %v917_v26 = vsel %vm828_vm4, %v911_v51, %v913_v4  ;;  %v918_v24 = vsel %vm828_vm4, %v913_v4, %v915_v36 }
 0x24e   : > { %v923_v8 = vadd.f32 %v917_v26, %v894_v42  ;;  %v924_v16 = vadd.f32 %v918_v24, %v895_v58 }
 0x254   : > { %v938_v11 = vpop.permute.xlu1 %937  ;;  %v974_v20 = vpop.permute.xlu2 %973 }
 0x255   : > { %v946_v45 = vsel %vm945_vm5, %v938_v11, %v940_v63 }
 0x256   : > { %v952_v13 = vadd.f32 %v946_v45, %v922_v10 }
 0x25c   : > { %v942_v28 = vpop.permute.xlu1 %941  ;;  %v999_v32 = vpop.permute.xlu2 %998 }
 0x25d   : > { %v947_v59 = vsel %vm945_vm5, %v940_v63, %v942_v28  ;;  %v948_v48 = vsel %vm945_vm5, %v942_v28, %v944_v7 }
 0x25e   : > { %v953_v31 = vadd.f32 %v947_v59, %v923_v8  ;;  %v954_v43 = vadd.f32 %v948_v48, %v924_v16 }
 0x264   : > { %v968_v23 = vpop.permute.xlu1 %967  ;;  %v1003_v40 = vpop.permute.xlu2 %1002 }
 0x265   : > { %v975_v29 = vsel %vm945_vm5, %v968_v23, %v970_v47 }
 0x266   : > { %v981_v30 = vadd.f32 %v975_v29, %v952_v13 }
 0x26c   : > { %v972_v62 = vpop.permute.xlu1 %971  ;;  %v1028_v39 = vpop.permute.xlu2 %1027 }
 0x26d   : > { %v976_v12 = vsel %vm945_vm5, %v970_v47, %v972_v62  ;;  %v977_v57 = vsel %vm945_vm5, %v972_v62, %v974_v20 }
 0x26e   : > { %v982_v37 = vadd.f32 %v976_v12, %v953_v31  ;;  %v983_v2 = vadd.f32 %v977_v57, %v954_v43 }
 0x274   : > { %v997_v21 = vpop.permute.xlu1 %996  ;;  %v1032_v53 = vpop.permute.xlu2 %1031 }
 0x275   : > { %v1004_v41 = vsel %vm945_vm5, %v997_v21, %v999_v32 }
 0x276   : > { %v1010_v50 = vadd.f32 %v1004_v41, %v981_v30 }
 0x27c   : > { %v1001_v51 = vpop.permute.xlu1 %1000  ;;  %v1057_v27 = vpop.permute.xlu2 %1056 }
 0x27d   : > { %v1005_v9 = vsel %vm945_vm5, %v999_v32, %v1001_v51  ;;  %v1006_v44 = vsel %vm945_vm5, %v1001_v51, %v1003_v40 }
 0x27e   : > { %v1011_v36 = vadd.f32 %v1005_v9, %v982_v37  ;;  %v1012_v56 = vadd.f32 %v1006_v44, %v983_v2 }
 0x284   : > { %v1026_v38 = vpop.permute.xlu1 %1025  ;;  %v1061_v7 = vpop.permute.xlu2 %1060 }
 0x285   : > { %v1033_v46 = vsel %vm945_vm5, %v1026_v38, %v1028_v39 }
 0x286   : > { %v1039_v52 = vadd.f32 %v1033_v46, %v1010_v50 }
 0x28c   : > { %v1030_v42 = vpop.permute.xlu1 %1029  ;;  %v1132_v28 = vpop.permute.xlu2 %1131 }
 0x28d   : > { %v1034_v58 = vsel %vm945_vm5, %v1028_v39, %v1030_v42  ;;  %v1035_v0 = vsel %vm945_vm5, %v1030_v42, %v1032_v53  ;;  %v1135_v59 = vmul.f32 %v1132_v28, %v1733_v15  ;;  %v1134_v48 = vmul.f32 %v1132_v28, %v1722_v6 }
 0x28e   : > { %v1040_v63 = vadd.f32 %v1034_v58, %v1011_v36  ;;  %v1041_v49 = vadd.f32 %v1035_v0, %v1012_v56  ;;  %v1136_v23 = vmul.f32 %v1132_v28, %v1730_v14  ;;  %v1137_v29 = vmul.f32 %v1132_v28, %v1740_v22 }
 0x294   : > { %v1055_v10 = vpop.permute.xlu1 %1054 }
 0x295   : > { %v1063_v1 = vsel %vm1062_vm6, %v1055_v10, %v1057_v27 }
 0x296   : > { %v2121_v3 = vadd.f32 %v1063_v1, %v1039_v52 }
 0x29c   : > { %v1059_v4 = vpop.permute.xlu1 %1058 }
 0x29d   : > { %v1064_v26 = vsel %vm1062_vm6, %v1057_v27, %v1059_v4  ;;  %v1065_v24 = vsel %vm1062_vm6, %v1059_v4, %v1061_v7 }
 0x29e   : > { %v2125_v8 = vadd.f32 %v1064_v26, %v1040_v63  ;;  %v2127_v16 = vadd.f32 %v1065_v24, %v1041_v49 }
 0x2a4   : > { %v1103_v11 = vpop.permute.xlu1 %1102 }
 0x2a5   : > { %v1105_v45 = vmul.f32 %v1103_v11, %v1698_v54  ;;  %v1106_v47 = vmul.f32 %v1103_v11, %v1711_v61  ;;  %v1107_v13 = vmul.f32 %v1103_v11, %v1709_v60  ;;  %v1108_v31 = vmul.f32 %v1103_v11, %v1720_v5 }
 0x2a7   : > { %1117 = vrot.lane.b32.xlu0 %v1107_v13, %s1572_s9  ;;  %1113 = vrot.lane.b32.xlu1 %v1105_v45, %s1572_s9 }
 0x2a8   : > { %1115 = vrot.lane.b32.xlu2 %v1106_v47, %s1572_s9 }
 0x2ad   : > { %v1161_v43 = vpop.permute.xlu1 %1160 }
 0x2ae   : > { %v1163_v20 = vmul.f32 %v1161_v43, %v1652_v19  ;;  %v1164_v30 = vmul.f32 %v1161_v43, %v1650_v18  ;;  %v1166_v32 = vmul.f32 %v1161_v43, %v1648_v17  ;;  %v1165_v62 = vmul.f32 %v1161_v43, %v1661_v25  ;;  %v1191_v19 = vpop.permute.xlu2 %1190  ;;  %v1220_v17 = vpop.permute.xlu0 %1219 }
 0x2af   : > { %1119 = vrot.lane.b32.xlu1 %v1108_v31, %s1572_s9  ;;  %1144 = vrot.lane.b32.xlu0 %v1135_v59, %s1572_s9  ;;  %v1193_v12 = vmul.f32 %v1191_v19, %v1670_v33  ;;  %v1195_v57 = vmul.f32 %v1191_v19, %v1674_v35  ;;  %v1194_v37 = vmul.f32 %v1191_v19, %v1672_v34 }
 0x2b0   : > { %1142 = vrot.lane.b32.xlu2 %v1134_v48, %s1572_s9  ;;  %v1223_v18 = vmul.f32 %v1220_v17, %v1711_v61  ;;  %v1222_v25 = vmul.f32 %v1220_v17, %v1698_v54  ;;  %v1196_v2 = vmul.f32 %v1191_v19, %v1700_v55  ;;  %v1224_v35 = vmul.f32 %v1220_v17, %v1709_v60 }
 0x2b1   : > { %v1225_v40 = vmul.f32 %v1220_v17, %v1720_v5 }
 0x2b6   : > { %v1249_v33 = vpop.permute.xlu1 %1248  ;;  %v1085_v60 = vpop.permute.xlu2 %1084 }
 0x2b7   : > { %1146 = vrot.lane.b32.xlu1 %v1136_v23, %s1572_s9  ;;  %1171 = vrot.lane.b32.xlu0 %v1163_v20, %s1576_s10  ;;  %v1251_v34 = vmul.f32 %v1249_v33, %v1722_v6  ;;  %v1252_v54 = vmul.f32 %v1249_v33, %v1733_v15  ;;  %v1254_v55 = vmul.f32 %v1249_v33, %v1740_v22  ;;  %v1091_v21 = vpop.permute.xlu0 %1090 }
 0x2b8   : > { %1148 = vrot.lane.b32.xlu2 %v1137_v29, %s1572_s9  ;;  %v1253_v61 = vmul.f32 %v1249_v33, %v1730_v14 }
 0x2be   : > { %v1089_v5 = vpop.permute.xlu2 %1088  ;;  %v1087_v41 = vpop.permute.xlu1 %1086 }
 0x2bf   : > { %1173 = vrot.lane.b32.xlu1 %v1164_v30, %s1576_s10  ;;  %1177 = vrot.lane.b32.xlu0 %v1166_v32, %s1576_s10  ;;  %v1094_v63 = vsel %vm1062_vm6, %v1089_v5, %v1091_v21  ;;  %v1092_v49 = vsel %vm1062_vm6, %v1085_v60, %v1087_v41  ;;  %v1093_v27 = vsel %vm1062_vm6, %v1087_v41, %v1089_v5 }
 0x2c0   : > { %1175 = vrot.lane.b32.xlu2 %v1165_v62, %s1576_s10  ;;  %v1100_v26 = vadd.f32 %v1094_v63, %v2127_v16  ;;  %v1098_v24 = vadd.f32 %v1092_v49, %v2121_v3  ;;  %v1099_v11 = vadd.f32 %v1093_v27, %v2125_v8 }
 0x2c7   : > { %1205 = vrot.lane.b32.xlu0 %v1195_v57, %s1576_s10  ;;  %1201 = vrot.lane.b32.xlu1 %v1193_v12, %s1576_s10 }
 0x2c8   : > { %1203 = vrot.lane.b32.xlu2 %v1194_v37, %s1576_s10  ;;  %v1279_v37 = vld [vmem:[%s2220_s2] sm:$0x7] }
 0x2cf   : > { %1232 = vrot.lane.b32.xlu0 %v1223_v18, %s1576_s10  ;;  %1207 = vrot.lane.b32.xlu1 %v1196_v2, %s1576_s10 }
 0x2d0   : > { %1230 = vrot.lane.b32.xlu2 %v1222_v25, %s1576_s10 }
 0x2d7   : > { %1259 = vrot.lane.b32.xlu0 %v1251_v34, %s1576_s10  ;;  %1234 = vrot.lane.b32.xlu1 %v1224_v35, %s1576_s10 }
 0x2d8   : > { %1236 = vrot.lane.b32.xlu2 %v1225_v40, %s1576_s10  ;;  %v1283_v40 = vperm.slane %v1279_v37, 2 }
 0x2df   : > { %1265 = vrot.lane.b32.xlu0 %v1254_v55, %s1576_s10  ;;  %1261 = vrot.lane.b32.xlu1 %v1252_v54, %s1576_s10  ;;  %v1281_v54 = vperm.slane %v1279_v37, 0 }
 0x2e0   : > { %1263 = vrot.lane.b32.xlu2 %v1253_v61, %s1576_s10 }
 0x302   : > { %v1116_v6 = vpop.permute.xlu2 %1115 }
 0x30a   : > { %v1143_v50 = vpop.permute.xlu2 %1142 }
 0x312   : > { %v1149_v44 = vpop.permute.xlu2 %1148 }
 0x319   : > { %v1118_v51 = vpop.permute.xlu0 %1117  ;;  %v1114_v9 = vpop.permute.xlu1 %1113 }
 0x31a   : > { %v1176_v22 = vpop.permute.xlu2 %1175  ;;  %v1122_v10 = vsel %vm1062_vm6, %v1116_v6, %v1118_v51  ;;  %v1121_v1 = vsel %vm1062_vm6, %v1114_v9, %v1116_v6  ;;  %v1282_v6 = vperm.slane %v1279_v37, 1 }
 0x31b   : > { %v1128_v28 = vadd.f32 %v1122_v10, %v1099_v11  ;;  %v1127_v59 = vadd.f32 %v1121_v1, %v1098_v24 }
 0x321   : > { %v1120_v15 = vpop.permute.xlu1 %1119  ;;  %v1145_v39 = vpop.permute.xlu0 %1144 }
 0x322   : > { %v1204_v46 = vpop.permute.xlu2 %1203  ;;  %v1123_v7 = vsel %vm1062_vm6, %v1118_v51, %v1120_v15  ;;  %v1150_v45 = vsel %vm1062_vm6, %v1143_v50, %v1145_v39 }
 0x323   : > { %v1129_v48 = vadd.f32 %v1123_v7, %v1100_v26  ;;  %v1156_v8 = vadd.f32 %v1150_v45, %v1127_v59 }
 0x329   : > { %v1147_v36 = vpop.permute.xlu1 %1146  ;;  %v1172_v14 = vpop.permute.xlu0 %1171 }
 0x32a   : > { %v1231_v42 = vpop.permute.xlu2 %1230  ;;  %v1151_v47 = vsel %vm1062_vm6, %v1145_v39, %v1147_v36  ;;  %v1152_v13 = vsel %vm1062_vm6, %v1147_v36, %v1149_v44 }
 0x32b   : > { %v1157_v23 = vadd.f32 %v1151_v47, %v1128_v28  ;;  %v1158_v29 = vadd.f32 %v1152_v13, %v1129_v48 }
 0x331   : > { %v1174_v56 = vpop.permute.xlu1 %1173  ;;  %v1178_v38 = vpop.permute.xlu0 %1177 }
 0x332   : > { %v1237_v4 = vpop.permute.xlu2 %1236  ;;  %v1180_v20 = vsel %vm1179_vm7, %v1172_v14, %v1174_v56  ;;  %v1181_v16 = vsel %vm1179_vm7, %v1174_v56, %v1176_v22  ;;  %v1182_v3 = vsel %vm1179_vm7, %v1176_v22, %v1178_v38 }
 0x333   : > { %v1186_v19 = vadd.f32 %v1180_v20, %v1156_v8  ;;  %v1187_v12 = vadd.f32 %v1181_v16, %v1157_v23  ;;  %v1188_v57 = vadd.f32 %v1182_v3, %v1158_v29 }
 0x339   : > { %v1206_v52 = vpop.permute.xlu0 %1205  ;;  %v1202_v53 = vpop.permute.xlu1 %1201 }
 0x33a   : > { %v1210_v30 = vsel %vm1179_vm7, %v1204_v46, %v1206_v52  ;;  %v1209_v32 = vsel %vm1179_vm7, %v1202_v53, %v1204_v46  ;;  %v1264_v35 = vpop.permute.xlu2 %1263 }
 0x33b   : > { %v1216_v2 = vadd.f32 %v1210_v30, %v1187_v12  ;;  %v1215_v33 = vadd.f32 %v1209_v32, %v1186_v19 }
 0x341   : > { %v1233_v58 = vpop.permute.xlu0 %1232  ;;  %v1208_v0 = vpop.permute.xlu1 %1207 }
 0x342   : > { %v1211_v62 = vsel %vm1179_vm7, %v1206_v52, %v1208_v0  ;;  %v1238_v17 = vsel %vm1179_vm7, %v1231_v42, %v1233_v58 }
 0x343   : > { %v1217_v34 = vadd.f32 %v1211_v62, %v1188_v57  ;;  %v1244_v55 = vadd.f32 %v1238_v17, %v1215_v33 }
 0x349   : > { %v1260_v31 = vpop.permute.xlu0 %1259  ;;  %v1235_v43 = vpop.permute.xlu1 %1234 }
 0x34a   : > { %v1239_v18 = vsel %vm1179_vm7, %v1233_v58, %v1235_v43  ;;  %v1240_v25 = vsel %vm1179_vm7, %v1235_v43, %v1237_v4 }
 0x34b   : > { %v1245_v61 = vadd.f32 %v1239_v18, %v1216_v2  ;;  %v1246_v60 = vadd.f32 %v1240_v25, %v1217_v34 }
 0x351   : > { %v1266_v5 = vpop.permute.xlu0 %1265  ;;  %v1262_v21 = vpop.permute.xlu1 %1261 }
 0x352   : > { %v1269_v41 = vsel %vm1179_vm7, %v1264_v35, %v1266_v5  ;;  %v1267_v50 = vsel %vm1179_vm7, %v1260_v31, %v1262_v21  ;;  %v1268_v51 = vsel %vm1179_vm7, %v1262_v21, %v1264_v35 }
 0x353   : > { %v1275_v9 = vadd.f32 %v1269_v41, %v1246_v60  ;;  %v1273_v44 = vadd.f32 %v1267_v50, %v1244_v55  ;;  %v1274_v15 = vadd.f32 %v1268_v51, %v1245_v61 }
 0x355   : > { %1278 = vst [vmem:[%s237_s16 + $0x10] sm:$0xff] %v1275_v9  ;;  %v1289_v39 = vmul.f32 %v1283_v40, %v1275_v9  ;;  %v1287_v22 = vmul.f32 %v1281_v54, %v1273_v44  ;;  %v1288_v36 = vmul.f32 %v1282_v6, %v1274_v15 }
 0x356   : > { %1276 = vst [vmem:[%s237_s16] sm:$0xff] %v1273_v44 }
 0x357   : > { %1277 = vst [vmem:[%s237_s16 + $0x8] sm:$0xff] %v1274_v15  ;;  %v1296_v14 = vmul.f32 %v1287_v22, %v1287_v22  ;;  %v1297_v56 = vmul.f32 %v1288_v36, %v1288_v36  ;;  %v1290_v38 = vadd.f32 %v1288_v36, %v1287_v22  ;;  %v1298_v52 = vmul.f32 %v1289_v39, %v1289_v39 }
 0x359   : > { %v1291_v46 = vadd.f32 %v1290_v38, %v1289_v39  ;;  %v1299_v53 = vadd.f32 %v1297_v56, %v1296_v14 }
 0x35b   : > { %1292 = vadd.xlane.f32.xlu1 %v1291_v46  ;;  %v1300_v42 = vadd.f32 %v1299_v53, %v1298_v52 }
 0x35d   : > { %1301 = vadd.xlane.f32.xlu2 %v1300_v42 }
 0x3ce   : > { %v1293_v58 = vpop.xlane.xlu1 %1292 }
 0x3cf   : > { %1295 = vst.msk [vmem:[%s241_s22] sm:$0xff] %vm1294_vm8, %v1293_v58 }
 0x3d0   : > { %v1302_v0 = vpop.xlane.xlu2 %1301 }
 0x3d1   : > { %1303 = vst.msk [vmem:[%s245_s25] sm:$0xff] %vm1294_vm8, %v1302_v0 }
 0x3d2 PF: > { %s16_s18 = sadd.s32 1, %s1531_s18  }
 0x3d3   : > { %p13_p4 = scmp.ge.s32.totalorder %s16_s18, 4  }
 0x3d5   :  { %15 = sbr.rel (!%p13_p4) target bundleno = 1 (0x1), region = 86 }

</bundles_post_ra>
